<compile_context>
chip_gen: v6e
topology: v6e:2x2x1
jax: 0.10.0
libtpu: 0.0.40
codegen_flags: <defaults>
</compile_context>

<pallas_src>
import functools

import jax
import jax.numpy as jnp
from jax.experimental import pallas as pl
from jax.experimental.pallas import tpu as pltpu

LANE = 128


def _pad_axis(a, axis, multiple):
    size = a.shape[axis]
    pad = (-size) % multiple
    if pad == 0:
        return a
    widths = [(0, 0)] * a.ndim
    widths[axis] = (0, pad)
    return jnp.pad(a, widths)


def _vmem_capacity_bytes():
    """Per-TC VMEM capacity; conservative (v7x = 64 MiB/TC) if unknown."""
    try:
        return int(pltpu.get_tpu_info().vmem_capacity_bytes)
    except Exception:
        return 64 * 1024 * 1024


def _layernorm_f32(x, gamma, beta, d_model_real):
    """f32 LayerNorm over the last axis; padded lanes masked out of stats.

    Padded (all-zero) rows have diff == 0 everywhere, so the rsqrt(eps) ~ 1e3
    factor multiplies zero and nothing non-finite can propagate.
    """
    d_pad = x.shape[-1]
    inv_d = 1.0 / d_model_real
    if d_pad != d_model_real:
        lane = jax.lax.broadcasted_iota(jnp.int32, x.shape, x.ndim - 1)
        mask = (lane < d_model_real).astype(jnp.float32)
        xm = x * mask
        mu = jnp.sum(xm, axis=-1, keepdims=True) * inv_d
        diff = (x - mu) * mask
    else:
        mu = jnp.sum(x, axis=-1, keepdims=True) * inv_d
        diff = x - mu
    var = jnp.sum(diff * diff, axis=-1, keepdims=True) * inv_d
    xn = diff * jax.lax.rsqrt(var + 1e-6)
    return xn * gamma + beta


# --------------------------------------------------------------------------
# Resident-weights kernel: 1-D grid over token tiles; W1/W2 live in VMEM.
# --------------------------------------------------------------------------
def ffn_resident_kernel(x_ref, gamma_ref, beta_ref, w1_ref, b1_ref, w2_ref,
                        b2_ref, o_ref, *, d_model_real, tf, n_chunks):
    x = x_ref[...].astype(jnp.float32)
    xn = _layernorm_f32(x, gamma_ref[...], beta_ref[...], d_model_real)
    xn = xn.astype(w1_ref.dtype)                      # bf16 MXU operand

    # Start from (residual + second-layer bias); each d_ff chunk adds
    # silu(xn @ W1_c + b1_c) @ W2_c.  Chunking keeps the (tm, tf) intermediate
    # small so the SiLU (EUP/VPU) of chunk c overlaps the MXU push of c+1.
    acc = x + b2_ref[...]
    for c in range(n_chunks):                         # statically unrolled
        c0 = c * tf
        h = jnp.dot(xn, w1_ref[:, c0:c0 + tf],
                    preferred_element_type=jnp.float32)
        h = h + b1_ref[:, c0:c0 + tf]
        h = h * jax.nn.sigmoid(h)                     # SiLU (dropout_1 = id)
        acc = acc + jnp.dot(h.astype(w2_ref.dtype), w2_ref[c0:c0 + tf, :],
                            preferred_element_type=jnp.float32)
    o_ref[...] = acc.astype(o_ref.dtype)              # dropout_2 = identity


# --------------------------------------------------------------------------
# Streaming kernel (fallback): 2-D grid, d_ff tiles streamed, f32 accumulator.
# --------------------------------------------------------------------------
def ffn_streaming_kernel(x_ref, gamma_ref, beta_ref, w1_ref, b1_ref, w2_ref,
                         b2_ref, o_ref, xn_ref, acc_ref, *, d_model_real):
    j = pl.program_id(1)

    @pl.when(j == 0)
    def _():
        x = x_ref[...].astype(jnp.float32)
        xn = _layernorm_f32(x, gamma_ref[...], beta_ref[...], d_model_real)
        xn_ref[...] = xn.astype(xn_ref.dtype)
        acc_ref[...] = jnp.zeros_like(acc_ref)

    h = jnp.dot(xn_ref[...], w1_ref[...], preferred_element_type=jnp.float32)
    h = h + b1_ref[...]
    h = h * jax.nn.sigmoid(h)                         # SiLU (dropout_1 = id)
    acc_ref[...] += jnp.dot(h.astype(w2_ref.dtype), w2_ref[...],
                            preferred_element_type=jnp.float32)

    @pl.when(j == pl.num_programs(1) - 1)
    def _():
        y = acc_ref[...] + b2_ref[...] + x_ref[...].astype(jnp.float32)
        o_ref[...] = y.astype(o_ref.dtype)            # dropout_2 = identity


def positionwise_ffn(x, gamma, beta, w1, b1, w2, b2, *,
                     tm=256, tf=512, matmul_dtype=jnp.bfloat16,
                     force_streaming=False):
    """x: (batch, seq, d_model) -> (batch, seq, d_model).

    gamma/beta: LayerNorm affine (d_model,)
    w1: (d_model, d_ff), b1: (d_ff,)   (w1/w2 transposed vs. nn.Linear.weight)
    w2: (d_ff, d_model), b2: (d_model,)
    """
    B, L, d_model = x.shape
    d_ff = w1.shape[1]
    N = B * L

    # Row tile must respect sublane packing of the activation dtype.
    row_min = 16 if x.dtype == jnp.bfloat16 else 8
    tm = max(row_min, (tm // row_min) * row_min)

    # Lane-dense padded model dim; d_ff chunk aligned to 256 (v6e/v7x MXU is
    # 2x 256x256) when d_ff allows, else 128.
    Dp = pl.cdiv(d_model, LANE) * LANE
    align = 256 if d_ff >= 256 else LANE
    tf = max(align, min(tf, pl.cdiv(d_ff, align) * align))
    tf = (tf // align) * align
    Fp = pl.cdiv(d_ff, tf) * tf
    Np = pl.cdiv(N, tm) * tm

    wbytes = jnp.dtype(matmul_dtype).itemsize
    x_bytes = jnp.dtype(x.dtype).itemsize
    weight_bytes = 2 * Dp * Fp * wbytes               # W1 + W2 (padded, bf16)
    cap = _vmem_capacity_bytes()
    # 2x for Pallas input buffering; stay well inside the per-TC VMEM.
    resident = (not force_streaming) and (
        2 * weight_bytes <= min(40 << 20, (cap * 3) // 5))

    # Host-side padding / dtype prep (zeros in padding keep the math exact).
    x2 = _pad_axis(_pad_axis(x.reshape(N, d_model), 1, Dp), 0, Np)
    gamma_p = _pad_axis(gamma.reshape(1, -1).astype(jnp.float32), 1, Dp)
    beta_p = _pad_axis(beta.reshape(1, -1).astype(jnp.float32), 1, Dp)
    w1_p = _pad_axis(_pad_axis(w1, 0, Dp), 1, Fp).astype(matmul_dtype)
    b1_p = _pad_axis(b1.reshape(1, -1).astype(jnp.float32), 1, Fp)
    w2_p = _pad_axis(_pad_axis(w2, 0, Fp), 1, Dp).astype(matmul_dtype)
    b2_p = _pad_axis(b2.reshape(1, -1).astype(jnp.float32), 1, Dp)

    flops = 4 * N * d_model * d_ff                    # two matmuls
    transcendentals = N * d_ff                        # sigmoid in SiLU

    if resident:
        n_chunks = Fp // tf
        needed = (2 * weight_bytes                    # resident W (buffered)
                  + 2 * tm * Dp * 4                   # x tiles (double buf)
                  + 2 * tm * Dp * x_bytes             # out tiles
                  + tm * Dp * (2 + 4)                 # xn bf16 + acc f32
                  + tm * tf * 4                       # h chunk f32
                  + 4 * (Dp + Fp) * 4)                # biases / affine
        vmem_limit = min(max(32 << 20, needed + (8 << 20)), (cap * 3) // 4)
        cost = pl.CostEstimate(
            flops=flops, transcendentals=transcendentals,
            bytes_accessed=(2 * N * d_model * x_bytes      # x in + out
                            + weight_bytes                 # weights ONCE
                            + (d_ff + 3 * d_model) * 4))
        out = pl.pallas_call(
            functools.partial(ffn_resident_kernel, d_model_real=d_model,
                              tf=tf, n_chunks=n_chunks),
            out_shape=jax.ShapeDtypeStruct((Np, Dp), x.dtype),
            grid_spec=pltpu.PrefetchScalarGridSpec(
                num_scalar_prefetch=0,
                grid=(Np // tm,),
                in_specs=[
                    pl.BlockSpec((tm, Dp), lambda i: (i, 0)),   # x tile
                    pl.BlockSpec((1, Dp), lambda i: (0, 0)),    # gamma
                    pl.BlockSpec((1, Dp), lambda i: (0, 0)),    # beta
                    pl.BlockSpec((Dp, Fp), lambda i: (0, 0)),   # W1 (resident)
                    pl.BlockSpec((1, Fp), lambda i: (0, 0)),    # b1
                    pl.BlockSpec((Fp, Dp), lambda i: (0, 0)),   # W2 (resident)
                    pl.BlockSpec((1, Dp), lambda i: (0, 0)),    # b2
                ],
                out_specs=pl.BlockSpec((tm, Dp), lambda i: (i, 0)),
            ),
            compiler_params=pltpu.CompilerParams(
                dimension_semantics=("parallel",),
                vmem_limit_bytes=int(vmem_limit)),
            cost_estimate=cost,
        )(x2, gamma_p, beta_p, w1_p, b1_p, w2_p, b2_p)
    else:
        grid = (Np // tm, Fp // tf)

        def _wspec(shape, index_map):
            # Triple-buffer the weight tiles (only large per-step DMA) to
            # close DMA bubbles at i-boundaries where j jumps last -> 0.
            try:
                return pl.BlockSpec(shape, index_map,
                                    pipeline_mode=pl.Buffered(3))
            except TypeError:
                return pl.BlockSpec(shape, index_map)

        needed = (2 * tm * Dp * 4 + 2 * tm * Dp * x_bytes
                  + 3 * 2 * Dp * tf * wbytes          # W1/W2 tiles, Buffered(3)
                  + tm * Dp * (2 + 4)                 # xn + acc scratch
                  + tm * tf * 4                       # h f32
                  + 4 * (Dp + tf) * 4 * 3)
        vmem_limit = min(max(32 << 20, needed + (8 << 20)), (cap * 3) // 4)
        cost = pl.CostEstimate(
            flops=flops, transcendentals=transcendentals,
            # W1/W2 are re-streamed once per token tile in this path.
            bytes_accessed=(2 * N * d_model * x_bytes
                            + (Np // tm) * weight_bytes
                            + (d_ff + 3 * d_model) * 4))
        out = pl.pallas_call(
            functools.partial(ffn_streaming_kernel, d_model_real=d_model),
            out_shape=jax.ShapeDtypeStruct((Np, Dp), x.dtype),
            grid_spec=pltpu.PrefetchScalarGridSpec(
                num_scalar_prefetch=0,
                grid=grid,
                in_specs=[
                    pl.BlockSpec((tm, Dp), lambda i, j: (i, 0)),   # x tile
                    pl.BlockSpec((1, Dp), lambda i, j: (0, 0)),    # gamma
                    pl.BlockSpec((1, Dp), lambda i, j: (0, 0)),    # beta
                    _wspec((Dp, tf), lambda i, j: (0, j)),         # W1 tile
                    pl.BlockSpec((1, tf), lambda i, j: (0, j)),    # b1 tile
                    _wspec((tf, Dp), lambda i, j: (j, 0)),         # W2 tile
                    pl.BlockSpec((1, Dp), lambda i, j: (0, 0)),    # b2
                ],
                out_specs=pl.BlockSpec((tm, Dp), lambda i, j: (i, 0)),
                scratch_shapes=[
                    pltpu.VMEM((tm, Dp), matmul_dtype),   # cached LayerNorm(x)
                    pltpu.VMEM((tm, Dp), jnp.float32),    # f32 accumulator
                ],
            ),
            compiler_params=pltpu.CompilerParams(
                dimension_semantics=("parallel", "arbitrary"),
                vmem_limit_bytes=int(vmem_limit)),
            cost_estimate=cost,
        )(x2, gamma_p, beta_p, w1_p, b1_p, w2_p, b2_p)

    return out[:N, :d_model].reshape(B, L, d_model)


if __name__ == "__main__":
    # Small shapes consistent with the module's forward:
    # x: (batch_size, input_len, model_dim)
    B, L, d_model, d_ff = 2, 8, 32, 64

    key = jax.random.PRNGKey(0)
    kx, kw1, kb1, kw2, kb2 = jax.random.split(key, 5)

    x = jax.random.normal(kx, (B, L, d_model), dtype=jnp.float32)

    # Deterministic synthetic parameters (not a checkpoint load).
    gamma = jnp.ones((d_model,), dtype=jnp.float32)    # LayerNorm weight
    beta = jnp.zeros((d_model,), dtype=jnp.float32)    # LayerNorm bias
    w1 = jax.random.normal(kw1, (d_model, d_ff), dtype=jnp.float32) * 0.05
    b1 = jax.random.normal(kb1, (d_ff,), dtype=jnp.float32) * 0.05
    w2 = jax.random.normal(kw2, (d_ff, d_model), dtype=jnp.float32) * 0.05
    b2 = jax.random.normal(kb2, (d_model,), dtype=jnp.float32) * 0.05

    # Pure-JAX (f32) reference of the module's forward.
    def ref(x):
        mu = jnp.mean(x, axis=-1, keepdims=True)
        var = jnp.mean((x - mu) ** 2, axis=-1, keepdims=True)
        xn = (x - mu) / jnp.sqrt(var + 1e-6) * gamma + beta
        h = xn @ w1 + b1
        h = h * jax.nn.sigmoid(h)
        y = h @ w2 + b2
        return y + x

    expected = ref(x)

    # Resident-weights fast path (default for these shapes).
    out = jax.block_until_ready(
        positionwise_ffn(x, gamma, beta, w1, b1, w2, b2))
    assert out.shape == (B, L, d_model)
    # bf16 matmul operands with f32 accumulation -> slightly looser tolerance.
    assert jnp.allclose(out, expected, atol=2e-2, rtol=2e-2), float(
        jnp.max(jnp.abs(out - expected)))

    # Streaming fallback path (exercised here for coverage).
    out_s = jax.block_until_ready(
        positionwise_ffn(x, gamma, beta, w1, b1, w2, b2,
                         force_streaming=True))
    assert jnp.allclose(out_s, expected, atol=2e-2, rtol=2e-2), float(
        jnp.max(jnp.abs(out_s - expected)))

    print("KERNEL_OK")
</pallas_src>

<mosaic_0001>
module attributes {stable_mosaic.version = 11 : i64} {
  func.func @ffn_resident_kernel(%arg0: i32, %arg1: memref<256x128xf32, #tpu.memory_space<vmem>>, %arg2: memref<1x128xf32, #tpu.memory_space<vmem>>, %arg3: memref<1x128xf32, #tpu.memory_space<vmem>>, %arg4: memref<128x128xbf16, #tpu.memory_space<vmem>>, %arg5: memref<1x128xf32, #tpu.memory_space<vmem>>, %arg6: memref<128x128xbf16, #tpu.memory_space<vmem>>, %arg7: memref<1x128xf32, #tpu.memory_space<vmem>>, %arg8: memref<256x128xf32, #tpu.memory_space<vmem>>) attributes {dimension_semantics = [#tpu.dimension_semantics<parallel>], iteration_bounds = array<i64: 1>, scalar_prefetch = 0 : i64, scratch_operands = 0 : i64, tpu.core_type = #tpu.core_type<tc>, window_params = [{transform_indices = @transform_0, window_bounds = array<i64: 256, 128>}, {pipeline_mode = #tpu.pipeline_mode<synchronous>, transform_indices = @transform_1, window_bounds = array<i64: 1, 128>}, {pipeline_mode = #tpu.pipeline_mode<synchronous>, transform_indices = @transform_2, window_bounds = array<i64: 1, 128>}, {pipeline_mode = #tpu.pipeline_mode<synchronous>, transform_indices = @transform_3, window_bounds = array<i64: 128, 128>}, {pipeline_mode = #tpu.pipeline_mode<synchronous>, transform_indices = @transform_4, window_bounds = array<i64: 1, 128>}, {pipeline_mode = #tpu.pipeline_mode<synchronous>, transform_indices = @transform_5, window_bounds = array<i64: 128, 128>}, {pipeline_mode = #tpu.pipeline_mode<synchronous>, transform_indices = @transform_6, window_bounds = array<i64: 1, 128>}, {transform_indices = @transform_7, window_bounds = array<i64: 256, 128>}]} {
    %c0 = arith.constant 0 : index
    %c0_0 = arith.constant 0 : index
    %0 = vector.load %arg1[%c0, %c0_0] : memref<256x128xf32, #tpu.memory_space<vmem>>, vector<256x128xf32>
    %c0_1 = arith.constant 0 : index
    %c0_2 = arith.constant 0 : index
    %1 = vector.load %arg2[%c0_1, %c0_2] : memref<1x128xf32, #tpu.memory_space<vmem>>, vector<1x128xf32>
    %c0_3 = arith.constant 0 : index
    %c0_4 = arith.constant 0 : index
    %2 = vector.load %arg3[%c0_3, %c0_4] : memref<1x128xf32, #tpu.memory_space<vmem>>, vector<1x128xf32>
    %3 = tpu.iota {dimensions = array<i32: 1>} : vector<256x128xi32>
    %c32_i32 = arith.constant 32 : i32
    %4 = vector.broadcast %c32_i32 : i32 to vector<256x128xi32>
    %5 = arith.cmpi slt, %3, %4 : vector<256x128xi32>
    %6 = arith.extui %5 : vector<256x128xi1> to vector<256x128xi32>
    %7 = arith.sitofp %6 : vector<256x128xi32> to vector<256x128xf32>
    %8 = arith.mulf %0, %7 : vector<256x128xf32>
    %cst = arith.constant dense<0.000000e+00> : vector<256xf32>
    %9 = vector.multi_reduction <add>, %8, %cst [1] : vector<256x128xf32> to vector<256xf32>
    %10 = vector.shape_cast %9 : vector<256xf32> to vector<256x1xf32>
    %cst_5 = arith.constant 3.125000e-02 : f32
    %11 = vector.broadcast %cst_5 : f32 to vector<256x1xf32>
    %12 = arith.mulf %10, %11 : vector<256x1xf32>
    %13 = vector.broadcast %12 : vector<256x1xf32> to vector<256x128xf32>
    %14 = arith.subf %0, %13 : vector<256x128xf32>
    %15 = arith.mulf %14, %7 : vector<256x128xf32>
    %16 = arith.mulf %15, %15 : vector<256x128xf32>
    %cst_6 = arith.constant dense<0.000000e+00> : vector<256xf32>
    %17 = vector.multi_reduction <add>, %16, %cst_6 [1] : vector<256x128xf32> to vector<256xf32>
    %18 = vector.shape_cast %17 : vector<256xf32> to vector<256x1xf32>
    %cst_7 = arith.constant 3.125000e-02 : f32
    %19 = vector.broadcast %cst_7 : f32 to vector<256x1xf32>
    %20 = arith.mulf %18, %19 : vector<256x1xf32>
    %cst_8 = arith.constant 9.99999997E-7 : f32
    %21 = vector.broadcast %cst_8 : f32 to vector<256x1xf32>
    %22 = arith.addf %20, %21 : vector<256x1xf32>
    %23 = math.rsqrt %22 : vector<256x1xf32>
    %24 = vector.broadcast %23 : vector<256x1xf32> to vector<256x128xf32>
    %25 = arith.mulf %15, %24 : vector<256x128xf32>
    %26 = vector.broadcast %1 : vector<1x128xf32> to vector<256x128xf32>
    %27 = arith.mulf %25, %26 : vector<256x128xf32>
    %28 = vector.broadcast %2 : vector<1x128xf32> to vector<256x128xf32>
    %29 = arith.addf %27, %28 : vector<256x128xf32>
    %30 = arith.truncf %29 : vector<256x128xf32> to vector<256x128xbf16>
    %c0_9 = arith.constant 0 : index
    %c0_10 = arith.constant 0 : index
    %31 = vector.load %arg7[%c0_9, %c0_10] : memref<1x128xf32, #tpu.memory_space<vmem>>, vector<1x128xf32>
    %32 = vector.broadcast %31 : vector<1x128xf32> to vector<256x128xf32>
    %33 = arith.addf %0, %32 : vector<256x128xf32>
    %c0_11 = arith.constant 0 : index
    %c0_12 = arith.constant 0 : index
    %34 = vector.load %arg4[%c0_11, %c0_12] : memref<128x128xbf16, #tpu.memory_space<vmem>>, vector<128x128xbf16>
    %cst_13 = arith.constant dense<0.000000e+00> : vector<256x128xf32>
    %35 = tpu.matmul %30, %34, %cst_13 {dimension_numbers = #tpu.dot_dimension_numbers<[1], [0], [0], [1], [0, 0, 1, 1], [], []>} : vector<256x128xbf16>, vector<128x128xbf16>, vector<256x128xf32> -> vector<256x128xf32>
    %c0_14 = arith.constant 0 : index
    %c0_15 = arith.constant 0 : index
    %36 = vector.load %arg5[%c0_14, %c0_15] : memref<1x128xf32, #tpu.memory_space<vmem>>, vector<1x128xf32>
    %37 = vector.broadcast %36 : vector<1x128xf32> to vector<256x128xf32>
    %38 = arith.addf %35, %37 : vector<256x128xf32>
    %39 = arith.negf %38 : vector<256x128xf32>
    %40 = math.exp %39 : vector<256x128xf32>
    %cst_16 = arith.constant 1.000000e+00 : f32
    %41 = vector.broadcast %cst_16 : f32 to vector<256x128xf32>
    %42 = arith.addf %41, %40 : vector<256x128xf32>
    %43 = arith.divf %41, %42 : vector<256x128xf32>
    %44 = arith.mulf %38, %43 : vector<256x128xf32>
    %45 = arith.truncf %44 : vector<256x128xf32> to vector<256x128xbf16>
    %c0_17 = arith.constant 0 : index
    %c0_18 = arith.constant 0 : index
    %46 = vector.load %arg6[%c0_17, %c0_18] : memref<128x128xbf16, #tpu.memory_space<vmem>>, vector<128x128xbf16>
    %cst_19 = arith.constant dense<0.000000e+00> : vector<256x128xf32>
    %47 = tpu.matmul %45, %46, %cst_19 {dimension_numbers = #tpu.dot_dimension_numbers<[1], [0], [0], [1], [0, 0, 1, 1], [], []>} : vector<256x128xbf16>, vector<128x128xbf16>, vector<256x128xf32> -> vector<256x128xf32>
    %48 = arith.addf %33, %47 : vector<256x128xf32>
    %c0_20 = arith.constant 0 : index
    %c0_21 = arith.constant 0 : index
    %49 = vector.load %arg8[%c0_20, %c0_21] : memref<256x128xf32, #tpu.memory_space<vmem>>, vector<256x128xf32>
    tpu.vector_store %arg8[%c0_20, %c0_21], %48 {strides = array<i32>} : memref<256x128xf32, #tpu.memory_space<vmem>>, vector<256x128xf32>,
    return
  }
  func.func @transform_0(%arg0: i32) -> (i32, i32) {
    %c0_i32 = arith.constant 0 : i32
    %c0_i32_0 = arith.constant 0 : i32
    return %arg0, %c0_i32 : i32, i32
  }
  func.func @transform_1(%arg0: i32) -> (i32, i32) {
    %c0_i32 = arith.constant 0 : i32
    %c0_i32_0 = arith.constant 0 : i32
    %c0_i32_1 = arith.constant 0 : i32
    return %c0_i32, %c0_i32_0 : i32, i32
  }
  func.func @transform_2(%arg0: i32) -> (i32, i32) {
    %c0_i32 = arith.constant 0 : i32
    %c0_i32_0 = arith.constant 0 : i32
    %c0_i32_1 = arith.constant 0 : i32
    return %c0_i32, %c0_i32_0 : i32, i32
  }
  func.func @transform_3(%arg0: i32) -> (i32, i32) {
    %c0_i32 = arith.constant 0 : i32
    %c0_i32_0 = arith.constant 0 : i32
    %c0_i32_1 = arith.constant 0 : i32
    return %c0_i32, %c0_i32_0 : i32, i32
  }
  func.func @transform_4(%arg0: i32) -> (i32, i32) {
    %c0_i32 = arith.constant 0 : i32
    %c0_i32_0 = arith.constant 0 : i32
    %c0_i32_1 = arith.constant 0 : i32
    return %c0_i32, %c0_i32_0 : i32, i32
  }
  func.func @transform_5(%arg0: i32) -> (i32, i32) {
    %c0_i32 = arith.constant 0 : i32
    %c0_i32_0 = arith.constant 0 : i32
    %c0_i32_1 = arith.constant 0 : i32
    return %c0_i32, %c0_i32_0 : i32, i32
  }
  func.func @transform_6(%arg0: i32) -> (i32, i32) {
    %c0_i32 = arith.constant 0 : i32
    %c0_i32_0 = arith.constant 0 : i32
    %c0_i32_1 = arith.constant 0 : i32
    return %c0_i32, %c0_i32_0 : i32, i32
  }
  func.func @transform_7(%arg0: i32) -> (i32, i32) {
    %c0_i32 = arith.constant 0 : i32
    %c0_i32_0 = arith.constant 0 : i32
    return %arg0, %c0_i32 : i32, i32
  }
}

</mosaic_0001>

<bundles_post_ra>
// kernel: tpu_custom_call.1
= control target key start
LH: loop header
LB: loop body
LE: loop exit
PB: predicated region body
PF: predicated region fallthrough
CT: control target
= control target key end

     0   :  { %12 = vsyncpa [#allocation3], 0  ;;  %s2663_s0 = inlined_call_operand.hbm [shape: f32[256,128], index: 0, kind: input, shape index: {}]   ;;  %s2664_s1 = inlined_call_operand.vmem [shape: f32[1,128], index: 1, kind: input, shape index: {}]   ;;  %s2665_s2 = inlined_call_operand.vmem [shape: f32[1,128], index: 2, kind: input, shape index: {}]   ;;  %s2666_s3 = inlined_call_operand.hbm [shape: bf16[128,128], index: 3, kind: input, shape index: {}]   ;;  %s2667_s4 = inlined_call_operand.vmem [shape: f32[1,128], index: 4, kind: input, shape index: {}]   ;;  %s2668_s5 = inlined_call_operand.hbm [shape: bf16[128,128], index: 5, kind: input, shape index: {}]   ;;  %s2669_s6 = inlined_call_operand.vmem [shape: f32[1,128], index: 6, kind: input, shape index: {}]   ;;  %s2670_s7 = inlined_call_operand.hbm [shape: f32[256,128], index: 7, kind: output, shape index: {}]  }
   0x1   :  { %13 = vsyncpa [#allocation6], 0 }
   0x2   :  { %14 = vsyncpa [#allocation4], 0  ;;  %s1966_s24 = smov [#allocation5]  }
   0x3   :  { %s36_s25 = sshll.u32 %s1966_s24, 4  ;;  %s37_s25 = int_to_ptr.vmem [resolvable:$true] %s36_s25 }
   0x4   :  { %s1888_s26 = scalar_lea.vmem %s37_s25, 1024  ;;  %p1893_p1 = scmp.lt.s32.totalorder %s37_s25, %s37_s25 }
   0x5   :  { %p1889_p0 = scmp.ne.s32.totalorder %s37_s25, %s1888_s26  ;;  %p1894_p2 = scmp.lt.s32.totalorder %s1888_s26, %s1888_s26 }
   0x7   :  { %p1895_p3 = por %p1894_p2, %p1893_p1 }
   0x9   :  { %p1896_p4 = pnand %p1895_p3, %p1889_p0 }
   0xb   :  { %1899 = shalt.err (!%p1896_p4)
}
   0xc   :  { %s1967_s27 = smov 64   ;;  %s1968_s28 = smov 4  }
   0xd   :  { %42 = dma.hbm_to_vmem [thread:$0]  %s2666_s3, 1024, %s37_s25, [#allocation6], %s1967_s27, %s1967_s27, %s1968_s28  }
   0xe   :  { %s1969_s8 = smov [#allocation2]  }
   0xf   :  { %s20_s9 = sshll.u32 %s1969_s8, 4  ;;  %s21_s9 = int_to_ptr.vmem [resolvable:$true] %s20_s9 }
  0x10   :  { %s1908_s10 = scalar_lea.vmem %s21_s9, 4096  ;;  %p1913_p6 = scmp.lt.s32.totalorder %s21_s9, %s21_s9 }
  0x11   :  { %p1909_p5 = scmp.ne.s32.totalorder %s21_s9, %s1908_s10  ;;  %p1914_p7 = scmp.lt.s32.totalorder %s1908_s10, %s1908_s10 }
  0x13   :  { %p1915_p8 = por %p1914_p7, %p1913_p6 }
  0x15   :  { %p1916_p9 = pnand %p1915_p8, %p1909_p5 }
  0x17   :  { %1919 = shalt.err (!%p1916_p9)
}
  0x18   :  { %s1970_s11 = smov 128   ;;  %s1971_s12 = smov 8  }
  0x19   :  { %26 = dma.hbm_to_vmem [thread:$0]  %s2663_s0, 4096, %s21_s9, [#allocation3], %s1970_s11, %s1970_s11, %s1971_s12  }
  0x1a   :  { %s1972_s3 = smov [#allocation7]  }
  0x1b   :  { %s50_s15 = sshll.u32 %s1972_s3, 4  ;;  %s51_s15 = int_to_ptr.vmem [resolvable:$true] %s50_s15 }
  0x1c   :  { %s1928_s16 = scalar_lea.vmem %s51_s15, 1024  ;;  %p1933_p11 = scmp.lt.s32.totalorder %s51_s15, %s51_s15 }
  0x1d   :  { %p1929_p10 = scmp.ne.s32.totalorder %s51_s15, %s1928_s16  ;;  %p1934_p12 = scmp.lt.s32.totalorder %s1928_s16, %s1928_s16 }
  0x1f   :  { %p1935_p13 = por %p1934_p12, %p1933_p11 }
  0x21   :  { %p1936_p0 = pnand %p1935_p13, %p1929_p10 }
  0x23   :  { %1939 = shalt.err (!%p1936_p0)
}
  0x24   :  { %56 = dma.hbm_to_vmem [thread:$0]  %s2668_s5, 1024, %s51_s15, [#allocation6], %s1967_s27, %s1967_s27, %s1968_s28  }
  0x25   :  { %1960 = dma.done.wait [#allocation3], 4096  }
  0x26   :  { %1961 = vsyncadd [#allocation3], 4294963200 }
  0x27   :  { %1962 = dma.done.wait [#allocation6], 2048  }
  0x28   :  { %1963 = vsyncadd [#allocation6], 4294965248  ;;  %v103_v0 = vlaneseq  ;;  %v1973_v2 = vmov 0.0   ;;  %v2029_v4 = vld [vmem:[#allocation2] sm:$0xff]  ;;  %v2031_v5 = vld [vmem:[#allocation2 + $0x10] sm:$0xff] }
  0x29   :  { %v2033_v6 = vld [vmem:[#allocation2 + $0x8] sm:$0xff]  ;;  %v2039_v9 = vld [vmem:[#allocation2 + $0x18] sm:$0xff]  ;;  %v2045_v12 = vld [vmem:[#allocation2 + $0x20] sm:$0xff] }
  0x2a   :  { %v104_v1 = vand.u32 127, %v103_v0  ;;  %v2047_v13 = vld [vmem:[#allocation2 + $0x28] sm:$0xff]  ;;  %v2053_v16 = vld [vmem:[#allocation2 + $0x30] sm:$0xff]  ;;  %v2055_v17 = vld [vmem:[#allocation2 + $0x38] sm:$0xff] }
  0x2b   :  { %v2057_v18 = vld [vmem:[#allocation2 + $0x40] sm:$0xff]  ;;  %v2059_v19 = vld [vmem:[#allocation2 + $0x48] sm:$0xff]  ;;  %v2065_v22 = vld [vmem:[#allocation2 + $0x50] sm:$0xff] }
  0x2c   :  { %vm105_vm0 = vcmp.lt.s32.totalorder %v104_v1, 32  ;;  %v2067_v23 = vld [vmem:[#allocation2 + $0x58] sm:$0xff]  ;;  %v2073_v26 = vld [vmem:[#allocation2 + $0x60] sm:$0xff]  ;;  %v2075_v27 = vld [vmem:[#allocation2 + $0x68] sm:$0xff] }
  0x2d   :  { %v2027_v3 = vsel %vm105_vm0, 1.0, %v1973_v2  ;;  %v2085_v32 = vld [vmem:[#allocation2 + $0x70] sm:$0xff]  ;;  %v2087_v33 = vld [vmem:[#allocation2 + $0x78] sm:$0xff]  ;;  %v2093_v36 = vld [vmem:[#allocation2 + $0x80] sm:$0xff] }
  0x2e   :  { %v108_v7 = vmul.f32 %v2027_v3, %v2029_v4  ;;  %v110_v8 = vmul.f32 %v2027_v3, %v2031_v5  ;;  %v109_v10 = vmul.f32 %v2027_v3, %v2033_v6  ;;  %v111_v11 = vmul.f32 %v2027_v3, %v2039_v9  ;;  %v2095_v37 = vld [vmem:[#allocation2 + $0x88] sm:$0xff]  ;;  %v2101_v40 = vld [vmem:[#allocation2 + $0x90] sm:$0xff]  ;;  %v2103_v41 = vld [vmem:[#allocation2 + $0x98] sm:$0xff] }
  0x2f   :  { %v112_v14 = vmul.f32 %v2027_v3, %v2045_v12  ;;  %v113_v15 = vmul.f32 %v2027_v3, %v2047_v13  ;;  %v114_v20 = vmul.f32 %v2027_v3, %v2053_v16  ;;  %v115_v21 = vmul.f32 %v2027_v3, %v2055_v17  ;;  %v2109_v44 = vld [vmem:[#allocation2 + $0xa0] sm:$0xff]  ;;  %v2111_v45 = vld [vmem:[#allocation2 + $0xa8] sm:$0xff]  ;;  %v2117_v48 = vld [vmem:[#allocation2 + $0xb0] sm:$0xff] }
  0x30   :  { %140 = vadd.xlane.f32.xlu0 %v108_v7  ;;  %144 = vadd.xlane.f32.xlu1 %v110_v8  ;;  %v116_v24 = vmul.f32 %v2027_v3, %v2057_v18  ;;  %v117_v25 = vmul.f32 %v2027_v3, %v2059_v19  ;;  %v118_v28 = vmul.f32 %v2027_v3, %v2065_v22  ;;  %v2119_v49 = vld [vmem:[#allocation2 + $0xb8] sm:$0xff]  ;;  %v2125_v52 = vld [vmem:[#allocation2 + $0xc0] sm:$0xff]  ;;  %v2127_v53 = vld [vmem:[#allocation2 + $0xc8] sm:$0xff] }
  0x31   :  { %v119_v29 = vmul.f32 %v2027_v3, %v2067_v23  ;;  %v120_v30 = vmul.f32 %v2027_v3, %v2073_v26  ;;  %v121_v31 = vmul.f32 %v2027_v3, %v2075_v27  ;;  %v122_v34 = vmul.f32 %v2027_v3, %v2085_v32  ;;  %v2133_v56 = vld [vmem:[#allocation2 + $0xd0] sm:$0xff]  ;;  %v2135_v57 = vld [vmem:[#allocation2 + $0xd8] sm:$0xff]  ;;  %v2141_v60 = vld [vmem:[#allocation2 + $0xe0] sm:$0xff] }
  0x32   :  { %v123_v35 = vmul.f32 %v2027_v3, %v2087_v33  ;;  %v124_v38 = vmul.f32 %v2027_v3, %v2093_v36  ;;  %v125_v39 = vmul.f32 %v2027_v3, %v2095_v37  ;;  %v126_v42 = vmul.f32 %v2027_v3, %v2101_v40  ;;  %v2143_v61 = vld [vmem:[#allocation2 + $0xe8] sm:$0xff]  ;;  %v2149_v0 = vld [vmem:[#allocation2 + $0xf0] sm:$0xff]  ;;  %v2151_v1 = vld [vmem:[#allocation2 + $0xf8] sm:$0xff] }
  0x33   :  { %v127_v43 = vmul.f32 %v2027_v3, %v2103_v41  ;;  %v128_v46 = vmul.f32 %v2027_v3, %v2109_v44  ;;  %v129_v47 = vmul.f32 %v2027_v3, %v2111_v45  ;;  %v130_v50 = vmul.f32 %v2027_v3, %v2117_v48 }
  0x34   :  { %142 = vadd.xlane.f32.xlu0 %v109_v10  ;;  %146 = vadd.xlane.f32.xlu1 %v111_v11  ;;  %v131_v51 = vmul.f32 %v2027_v3, %v2119_v49  ;;  %v132_v54 = vmul.f32 %v2027_v3, %v2125_v52  ;;  %v133_v55 = vmul.f32 %v2027_v3, %v2127_v53 }
  0x35   :  { %v134_v58 = vmul.f32 %v2027_v3, %v2133_v56  ;;  %v135_v59 = vmul.f32 %v2027_v3, %v2135_v57  ;;  %v136_v62 = vmul.f32 %v2027_v3, %v2141_v60  ;;  %v137_v63 = vmul.f32 %v2027_v3, %v2143_v61 }
  0x36   :  { %v138_v2 = vmul.f32 %v2027_v3, %v2149_v0  ;;  %v139_v7 = vmul.f32 %v2027_v3, %v2151_v1 }
  0x38   :  { %148 = vadd.xlane.f32.xlu0 %v112_v14  ;;  %150 = vadd.xlane.f32.xlu1 %v113_v15 }
  0x3c   :  { %152 = vadd.xlane.f32.xlu0 %v114_v20  ;;  %154 = vadd.xlane.f32.xlu1 %v115_v21 }
  0x40   :  { %156 = vadd.xlane.f32.xlu0 %v116_v24  ;;  %158 = vadd.xlane.f32.xlu1 %v117_v25 }
  0x44   :  { %160 = vadd.xlane.f32.xlu0 %v118_v28  ;;  %162 = vadd.xlane.f32.xlu1 %v119_v29 }
  0x48   :  { %164 = vadd.xlane.f32.xlu0 %v120_v30  ;;  %166 = vadd.xlane.f32.xlu1 %v121_v31 }
  0x4c   :  { %168 = vadd.xlane.f32.xlu0 %v122_v34  ;;  %170 = vadd.xlane.f32.xlu1 %v123_v35 }
  0x50   :  { %172 = vadd.xlane.f32.xlu0 %v124_v38  ;;  %174 = vadd.xlane.f32.xlu1 %v125_v39 }
  0x54   :  { %176 = vadd.xlane.f32.xlu0 %v126_v42  ;;  %178 = vadd.xlane.f32.xlu1 %v127_v43 }
  0x58   :  { %180 = vadd.xlane.f32.xlu0 %v128_v46  ;;  %182 = vadd.xlane.f32.xlu1 %v129_v47 }
  0x5c   :  { %184 = vadd.xlane.f32.xlu0 %v130_v50  ;;  %186 = vadd.xlane.f32.xlu1 %v131_v51 }
  0x60   :  { %188 = vadd.xlane.f32.xlu0 %v132_v54  ;;  %190 = vadd.xlane.f32.xlu1 %v133_v55 }
  0x64   :  { %192 = vadd.xlane.f32.xlu0 %v134_v58  ;;  %194 = vadd.xlane.f32.xlu1 %v135_v59 }
  0x68   :  { %196 = vadd.xlane.f32.xlu0 %v136_v62  ;;  %198 = vadd.xlane.f32.xlu1 %v137_v63 }
  0x6c   :  { %200 = vadd.xlane.f32.xlu0 %v138_v2  ;;  %202 = vadd.xlane.f32.xlu1 %v139_v7 }
  0xb9   :  { %v141_v8 = vpop.xlane.xlu0 %140  ;;  %v145_v10 = vpop.xlane.xlu1 %144 }
  0xba   :  { %v204_v11 = vmul.f32 0.03125, %v141_v8  ;;  %v206_v14 = vmul.f32 0.03125, %v145_v10 }
  0xbc   :  { %v236_v15 = vsub.f32 %v2029_v4, %v204_v11  ;;  %v238_v20 = vsub.f32 %v2031_v5, %v206_v14 }
  0xbd   :  { %v143_v21 = vpop.xlane.xlu0 %142  ;;  %v147_v24 = vpop.xlane.xlu1 %146 }
  0xbe   :  { %v205_v25 = vmul.f32 0.03125, %v143_v21  ;;  %v207_v28 = vmul.f32 0.03125, %v147_v24  ;;  %v2160_v29 = vmul.f32 %v2027_v3, %v236_v15  ;;  %v2163_v30 = vmul.f32 %v2027_v3, %v238_v20  ;;  %v1640_v21 = vld [vmem:[#allocation5 + $0x38] sm:$0xff]  }
  0xbf   :  { %1535 = vmatprep.subr.bf16.mxu0 %v1640_v21 }
  0xc0   :  { %v237_v31 = vsub.f32 %v2033_v6, %v205_v25  ;;  %v239_v34 = vsub.f32 %v2039_v9, %v207_v28  ;;  %v300_v35 = vmul.f32 %v2160_v29, %v2160_v29  ;;  %v302_v5 = vmul.f32 %v2163_v30, %v2163_v30  ;;  %1536 = vmatpush3.bf16.msra.mxu0 %v1640_v21 }
  0xc1   :  { %v149_v4 = vpop.xlane.xlu0 %148  ;;  %v151_v38 = vpop.xlane.xlu1 %150 }
  0xc2   :  { %v208_v39 = vmul.f32 0.03125, %v149_v4  ;;  %332 = vadd.xlane.f32.xlu0 %v300_v35  ;;  %v209_v42 = vmul.f32 0.03125, %v151_v38  ;;  %v2172_v43 = vmul.f32 %v2027_v3, %v237_v31  ;;  %v2175_v46 = vmul.f32 %v2027_v3, %v239_v34 }
  0xc4   :  { %v240_v6 = vsub.f32 %v2045_v12, %v208_v39  ;;  %v241_v9 = vsub.f32 %v2047_v13, %v209_v42  ;;  %v301_v47 = vmul.f32 %v2172_v43, %v2172_v43  ;;  %v303_v54 = vmul.f32 %v2175_v46, %v2175_v46 }
  0xc5   :  { %v153_v50 = vpop.xlane.xlu0 %152  ;;  %v155_v51 = vpop.xlane.xlu1 %154 }
  0xc6   :  { %v210_v55 = vmul.f32 0.03125, %v153_v50  ;;  %336 = vadd.xlane.f32.xlu0 %v302_v5  ;;  %334 = vadd.xlane.f32.xlu1 %v301_v47  ;;  %v211_v58 = vmul.f32 0.03125, %v155_v51  ;;  %v2184_v59 = vmul.f32 %v2027_v3, %v240_v6  ;;  %v2187_v62 = vmul.f32 %v2027_v3, %v241_v9  ;;  %v1641_v6 = vld [vmem:[#allocation5 + $0x30] sm:$0xff]  }
  0xc7   :  { %1537 = vmatprep.subr.bf16.mxu0 %v1641_v6 }
  0xc8   :  { %v242_v12 = vsub.f32 %v2053_v16, %v210_v55  ;;  %v243_v13 = vsub.f32 %v2055_v17, %v211_v58  ;;  %v304_v63 = vmul.f32 %v2184_v59, %v2184_v59  ;;  %v305_v8 = vmul.f32 %v2187_v62, %v2187_v62  ;;  %1538 = vmatpush3.bf16.msra.mxu0 %v1641_v6 }
  0xc9   :  { %v157_v2 = vpop.xlane.xlu0 %156  ;;  %v159_v7 = vpop.xlane.xlu1 %158 }
  0xca   :  { %v212_v10 = vmul.f32 0.03125, %v157_v2  ;;  %338 = vadd.xlane.f32.xlu1 %v303_v54  ;;  %340 = vadd.xlane.f32.xlu0 %v304_v63  ;;  %v213_v11 = vmul.f32 0.03125, %v159_v7  ;;  %v2196_v14 = vmul.f32 %v2027_v3, %v242_v12  ;;  %v2199_v15 = vmul.f32 %v2027_v3, %v243_v13  ;;  %v1642_v13 = vld [vmem:[#allocation5 + $0x28] sm:$0xff]  }
  0xcb   :  { %1539 = vmatprep.subr.bf16.mxu0 %v1642_v13 }
  0xcc   :  { %v244_v16 = vsub.f32 %v2057_v18, %v212_v10  ;;  %v245_v17 = vsub.f32 %v2059_v19, %v213_v11  ;;  %v306_v20 = vmul.f32 %v2196_v14, %v2196_v14  ;;  %v307_v28 = vmul.f32 %v2199_v15, %v2199_v15  ;;  %1540 = vmatpush3.bf16.msra.mxu0 %v1642_v13 }
  0xcd   :  { %v161_v24 = vpop.xlane.xlu0 %160  ;;  %v163_v25 = vpop.xlane.xlu1 %162 }
  0xce   :  { %v214_v31 = vmul.f32 0.03125, %v161_v24  ;;  %342 = vadd.xlane.f32.xlu1 %v305_v8  ;;  %344 = vadd.xlane.f32.xlu0 %v306_v20  ;;  %v215_v34 = vmul.f32 0.03125, %v163_v25  ;;  %v2208_v35 = vmul.f32 %v2027_v3, %v244_v16  ;;  %v2211_v18 = vmul.f32 %v2027_v3, %v245_v17  ;;  %v1643_v20 = vld [vmem:[#allocation5 + $0x20] sm:$0xff]  }
  0xcf   :  { %1541 = vmatprep.subr.bf16.mxu0 %v1643_v20 }
  0xd0   :  { %v246_v19 = vsub.f32 %v2065_v22, %v214_v31  ;;  %v247_v4 = vsub.f32 %v2067_v23, %v215_v34  ;;  %v308_v38 = vmul.f32 %v2208_v35, %v2208_v35  ;;  %v309_v42 = vmul.f32 %v2211_v18, %v2211_v18  ;;  %1542 = vmatpush3.bf16.msra.mxu0 %v1643_v20 }
  0xd1   :  { %v165_v5 = vpop.xlane.xlu0 %164  ;;  %v167_v39 = vpop.xlane.xlu1 %166 }
  0xd2   :  { %v216_v9 = vmul.f32 0.03125, %v165_v5  ;;  %346 = vadd.xlane.f32.xlu1 %v307_v28  ;;  %348 = vadd.xlane.f32.xlu0 %v308_v38  ;;  %v217_v47 = vmul.f32 0.03125, %v167_v39  ;;  %v2220_v50 = vmul.f32 %v2027_v3, %v246_v19  ;;  %v2223_v22 = vmul.f32 %v2027_v3, %v247_v4  ;;  %v1644_v38 = vld [vmem:[#allocation5 + $0x18] sm:$0xff]  }
  0xd3   :  { %1543 = vmatprep.subr.bf16.mxu0 %v1644_v38 }
  0xd4   :  { %v248_v23 = vsub.f32 %v2073_v26, %v216_v9  ;;  %v249_v51 = vsub.f32 %v2075_v27, %v217_v47  ;;  %v310_v54 = vmul.f32 %v2220_v50, %v2220_v50  ;;  %v311_v12 = vmul.f32 %v2223_v22, %v2223_v22  ;;  %1544 = vmatpush3.bf16.msra.mxu0 %v1644_v38 }
  0xd5   :  { %v169_v55 = vpop.xlane.xlu0 %168  ;;  %v171_v58 = vpop.xlane.xlu1 %170 }
  0xd6   :  { %v218_v63 = vmul.f32 0.03125, %v169_v55  ;;  %350 = vadd.xlane.f32.xlu1 %v309_v42  ;;  %352 = vadd.xlane.f32.xlu0 %v310_v54  ;;  %v219_v2 = vmul.f32 0.03125, %v171_v58  ;;  %v2232_v7 = vmul.f32 %v2027_v3, %v248_v23  ;;  %v2235_v26 = vmul.f32 %v2027_v3, %v249_v51  ;;  %v1645_v54 = vld [vmem:[#allocation5 + $0x10] sm:$0xff]  }
  0xd7   :  { %1545 = vmatprep.subr.bf16.mxu0 %v1645_v54 }
  0xd8   :  { %v250_v27 = vsub.f32 %v2085_v32, %v218_v63  ;;  %v251_v8 = vsub.f32 %v2087_v33, %v219_v2  ;;  %v312_v10 = vmul.f32 %v2232_v7, %v2232_v7  ;;  %v313_v17 = vmul.f32 %v2235_v26, %v2235_v26  ;;  %1546 = vmatpush3.bf16.msra.mxu0 %v1645_v54 }
  0xd9   :  { %v173_v11 = vpop.xlane.xlu0 %172  ;;  %v175_v16 = vpop.xlane.xlu1 %174 }
  0xda   :  { %v220_v21 = vmul.f32 0.03125, %v173_v11  ;;  %354 = vadd.xlane.f32.xlu1 %v311_v12  ;;  %356 = vadd.xlane.f32.xlu0 %v312_v10  ;;  %v221_v24 = vmul.f32 0.03125, %v175_v16  ;;  %v2244_v25 = vmul.f32 %v2027_v3, %v250_v27  ;;  %v2247_v32 = vmul.f32 %v2027_v3, %v251_v8  ;;  %v1646_v10 = vld [vmem:[#allocation5 + $0x8] sm:$0xff]  }
  0xdb   :  { %1547 = vmatprep.subr.bf16.mxu0 %v1646_v10 }
  0xdc   :  { %v252_v33 = vsub.f32 %v2093_v36, %v220_v21  ;;  %v253_v28 = vsub.f32 %v2095_v37, %v221_v24  ;;  %v314_v31 = vmul.f32 %v2244_v25, %v2244_v25  ;;  %v315_v4 = vmul.f32 %v2247_v32, %v2247_v32  ;;  %1548 = vmatpush3.bf16.msra.mxu0 %v1646_v10 }
  0xdd   :  { %v177_v34 = vpop.xlane.xlu0 %176  ;;  %v179_v19 = vpop.xlane.xlu1 %178 }
  0xde   :  { %v222_v5 = vmul.f32 0.03125, %v177_v34  ;;  %358 = vadd.xlane.f32.xlu1 %v313_v17  ;;  %360 = vadd.xlane.f32.xlu0 %v314_v31  ;;  %v223_v39 = vmul.f32 0.03125, %v179_v19  ;;  %v2256_v42 = vmul.f32 %v2027_v3, %v252_v33  ;;  %v2259_v36 = vmul.f32 %v2027_v3, %v253_v28  ;;  %v1647_v31 = vld [vmem:[#allocation5] sm:$0xff]  }
  0xdf   :  { %1549 = vmatprep.subr.bf16.mxu0 %v1647_v31 }
  0xe0   :  { %v254_v37 = vsub.f32 %v2101_v40, %v222_v5  ;;  %v255_v6 = vsub.f32 %v2103_v41, %v223_v39  ;;  %v316_v9 = vmul.f32 %v2256_v42, %v2256_v42  ;;  %v317_v51 = vmul.f32 %v2259_v36, %v2259_v36  ;;  %1550 = vmatpush3.bf16.msra.mxu0 %v1647_v31 }
  0xe1   :  { %v181_v47 = vpop.xlane.xlu0 %180  ;;  %v183_v23 = vpop.xlane.xlu1 %182 }
  0xe2   :  { %v224_v55 = vmul.f32 0.03125, %v181_v47  ;;  %362 = vadd.xlane.f32.xlu1 %v315_v4  ;;  %364 = vadd.xlane.f32.xlu0 %v316_v9  ;;  %v225_v58 = vmul.f32 0.03125, %v183_v23  ;;  %v2268_v12 = vmul.f32 %v2027_v3, %v254_v37  ;;  %v2271_v40 = vmul.f32 %v2027_v3, %v255_v6 }
  0xe4   :  { %v256_v41 = vsub.f32 %v2109_v44, %v224_v55  ;;  %v257_v13 = vsub.f32 %v2111_v45, %v225_v58  ;;  %v318_v63 = vmul.f32 %v2268_v12, %v2268_v12  ;;  %v319_v8 = vmul.f32 %v2271_v40, %v2271_v40 }
  0xe5   :  { %v185_v2 = vpop.xlane.xlu0 %184  ;;  %v187_v27 = vpop.xlane.xlu1 %186 }
  0xe6   :  { %v226_v11 = vmul.f32 0.03125, %v185_v2  ;;  %366 = vadd.xlane.f32.xlu1 %v317_v51  ;;  %368 = vadd.xlane.f32.xlu0 %v318_v63  ;;  %v227_v16 = vmul.f32 0.03125, %v187_v27  ;;  %v2280_v17 = vmul.f32 %v2027_v3, %v256_v41  ;;  %v2283_v44 = vmul.f32 %v2027_v3, %v257_v13 }
  0xe8   :  { %v258_v45 = vsub.f32 %v2117_v48, %v226_v11  ;;  %v259_v20 = vsub.f32 %v2119_v49, %v227_v16  ;;  %v320_v21 = vmul.f32 %v2280_v17, %v2280_v17  ;;  %v321_v28 = vmul.f32 %v2283_v44, %v2283_v44 }
  0xe9   :  { %v189_v24 = vpop.xlane.xlu0 %188  ;;  %v191_v33 = vpop.xlane.xlu1 %190 }
  0xea   :  { %v228_v34 = vmul.f32 0.03125, %v189_v24  ;;  %370 = vadd.xlane.f32.xlu1 %v319_v8  ;;  %372 = vadd.xlane.f32.xlu0 %v320_v21  ;;  %v229_v19 = vmul.f32 0.03125, %v191_v33  ;;  %v2292_v4 = vmul.f32 %v2027_v3, %v258_v45  ;;  %v2295_v48 = vmul.f32 %v2027_v3, %v259_v20 }
  0xec   :  { %v260_v49 = vsub.f32 %v2125_v52, %v228_v34  ;;  %v261_v38 = vsub.f32 %v2127_v53, %v229_v19  ;;  %v322_v5 = vmul.f32 %v2292_v4, %v2292_v4  ;;  %v323_v6 = vmul.f32 %v2295_v48, %v2295_v48 }
  0xed   :  { %v193_v39 = vpop.xlane.xlu0 %192  ;;  %v195_v37 = vpop.xlane.xlu1 %194 }
  0xee   :  { %v230_v9 = vmul.f32 0.03125, %v193_v39  ;;  %374 = vadd.xlane.f32.xlu1 %v321_v28  ;;  %376 = vadd.xlane.f32.xlu0 %v322_v5  ;;  %v231_v47 = vmul.f32 0.03125, %v195_v37  ;;  %v2304_v23 = vmul.f32 %v2027_v3, %v260_v49  ;;  %v2307_v52 = vmul.f32 %v2027_v3, %v261_v38 }
  0xf0   :  { %v262_v53 = vsub.f32 %v2133_v56, %v230_v9  ;;  %v263_v51 = vsub.f32 %v2135_v57, %v231_v47  ;;  %v324_v54 = vmul.f32 %v2304_v23, %v2304_v23  ;;  %v325_v41 = vmul.f32 %v2307_v52, %v2307_v52 }
  0xf1   :  { %v197_v55 = vpop.xlane.xlu0 %196  ;;  %v199_v58 = vpop.xlane.xlu1 %198 }
  0xf2   :  { %v232_v13 = vmul.f32 0.03125, %v197_v55  ;;  %378 = vadd.xlane.f32.xlu1 %v323_v6  ;;  %380 = vadd.xlane.f32.xlu0 %v324_v54  ;;  %v233_v63 = vmul.f32 0.03125, %v199_v58  ;;  %v2316_v2 = vmul.f32 %v2027_v3, %v262_v53  ;;  %v2319_v27 = vmul.f32 %v2027_v3, %v263_v51 }
  0xf4   :  { %v264_v56 = vsub.f32 %v2141_v60, %v232_v13  ;;  %v265_v57 = vsub.f32 %v2143_v61, %v233_v63  ;;  %v326_v8 = vmul.f32 %v2316_v2, %v2316_v2  ;;  %v327_v16 = vmul.f32 %v2319_v27, %v2319_v27 }
  0xf5   :  { %v201_v10 = vpop.xlane.xlu0 %200  ;;  %v203_v11 = vpop.xlane.xlu1 %202 }
  0xf6   :  { %v234_v45 = vmul.f32 0.03125, %v201_v10  ;;  %382 = vadd.xlane.f32.xlu1 %v325_v41  ;;  %384 = vadd.xlane.f32.xlu0 %v326_v8  ;;  %v235_v20 = vmul.f32 0.03125, %v203_v11  ;;  %v2328_v21 = vmul.f32 %v2027_v3, %v264_v56  ;;  %v2331_v24 = vmul.f32 %v2027_v3, %v265_v57 }
  0xf8   :  { %v266_v60 = vsub.f32 %v2149_v0, %v234_v45  ;;  %v267_v61 = vsub.f32 %v2151_v1, %v235_v20  ;;  %v328_v33 = vmul.f32 %v2328_v21, %v2328_v21  ;;  %v329_v28 = vmul.f32 %v2331_v24, %v2331_v24 }
  0xfa   :  { %386 = vadd.xlane.f32.xlu1 %v327_v16  ;;  %388 = vadd.xlane.f32.xlu0 %v328_v33  ;;  %v2340_v31 = vmul.f32 %v2027_v3, %v266_v60  ;;  %v2343_v34 = vmul.f32 %v2027_v3, %v267_v61  ;;  %v2352_v33 = vld [vmem:[%s2664_s1] ss:$0 sm:$0xff] }
  0xfc   :  { %v330_v19 = vmul.f32 %v2340_v31, %v2340_v31  ;;  %v331_v0 = vmul.f32 %v2343_v34, %v2343_v34 }
  0xfe   :  { %390 = vadd.xlane.f32.xlu1 %v329_v28  ;;  %392 = vadd.xlane.f32.xlu0 %v330_v19 }
 0x102   :  { %394 = vadd.xlane.f32.xlu1 %v331_v0 }
 0x14b   :  { %v333_v1 = vpop.xlane.xlu0 %332 }
 0x14c   :  { %v396_v49 = vmul.f32 0.03125, %v333_v1 }
 0x14e   :  { %v428_v38 = vadd.f32 1e-06, %v396_v49 }
 0x14f   :  { %v335_v5 = vpop.xlane.xlu1 %334  ;;  %v337_v39 = vpop.xlane.xlu0 %336 }
 0x150   :  { %1656 = vrsqrt.f32 %v428_v38  ;;  %v397_v37 = vmul.f32 0.03125, %v335_v5  ;;  %v398_v6 = vmul.f32 0.03125, %v337_v39 }
 0x152   :  { %v429_v9 = vadd.f32 1e-06, %v397_v37  ;;  %v430_v3 = vadd.f32 1e-06, %v398_v6 }
 0x153   :  { %v339_v47 = vpop.xlane.xlu1 %338  ;;  %v341_v53 = vpop.xlane.xlu0 %340 }
 0x154   :  { %1658 = vrsqrt.f32 %v429_v9  ;;  %v399_v51 = vmul.f32 0.03125, %v339_v47  ;;  %v400_v54 = vmul.f32 0.03125, %v341_v53  ;;  %v2359_v9 = vld [vmem:[%s2665_s2] ss:$0 sm:$0xff] }
 0x155   :  { %1660 = vrsqrt.f32 %v430_v3 }
 0x156   :  { %v431_v55 = vadd.f32 1e-06, %v399_v51  ;;  %v432_v58 = vadd.f32 1e-06, %v400_v54 }
 0x157   :  { %v343_v41 = vpop.xlane.xlu1 %342  ;;  %v345_v13 = vpop.xlane.xlu0 %344 }
 0x158   :  { %1662 = vrsqrt.f32 %v431_v55  ;;  %v401_v63 = vmul.f32 0.03125, %v343_v41  ;;  %v402_v56 = vmul.f32 0.03125, %v345_v13 }
 0x159   :  { %1664 = vrsqrt.f32 %v432_v58 }
 0x15a   :  { %v433_v57 = vadd.f32 1e-06, %v401_v63  ;;  %v434_v8 = vadd.f32 1e-06, %v402_v56 }
 0x15b   :  { %v347_v10 = vpop.xlane.xlu1 %346  ;;  %v349_v11 = vpop.xlane.xlu0 %348 }
 0x15c   :  { %1666 = vrsqrt.f32 %v433_v57  ;;  %v403_v16 = vmul.f32 0.03125, %v347_v10  ;;  %v404_v45 = vmul.f32 0.03125, %v349_v11 }
 0x15d   :  { %v1657_v20 = vpop.eup %1656  ;;  %1668 = vrsqrt.f32 %v434_v8 }
 0x15e   :  { %v435_v60 = vadd.f32 1e-06, %v403_v16  ;;  %v436_v61 = vadd.f32 1e-06, %v404_v45  ;;  %v492_v28 = vmul.f32 %v1657_v20, %v2160_v29 }
 0x15f   :  { %v351_v19 = vpop.xlane.xlu1 %350  ;;  %v353_v0 = vpop.xlane.xlu0 %352 }
 0x160   :  { %1670 = vrsqrt.f32 %v435_v60  ;;  %v405_v1 = vmul.f32 0.03125, %v351_v19  ;;  %v406_v49 = vmul.f32 0.03125, %v353_v0  ;;  %v530_v5 = vmul.f32 %v2352_v33, %v492_v28 }
 0x161   :  { %v1659_v38 = vpop.eup %1658  ;;  %1672 = vrsqrt.f32 %v436_v61 }
 0x162   :  { %v1661_v39 = vpop.eup %1660  ;;  %v437_v37 = vadd.f32 1e-06, %v405_v1  ;;  %v438_v6 = vadd.f32 1e-06, %v406_v49  ;;  %v493_v3 = vmul.f32 %v1659_v38, %v2172_v43  ;;  %v568_v41 = vadd.f32 %v2359_v9, %v530_v5 }
 0x163   :  { %v355_v29 = vpop.xlane.xlu1 %354  ;;  %v357_v47 = vpop.xlane.xlu0 %356  ;;  %v494_v53 = vmul.f32 %v1661_v39, %v2163_v30 }
 0x164   :  { %1674 = vrsqrt.f32 %v437_v37  ;;  %v407_v51 = vmul.f32 0.03125, %v355_v29  ;;  %v408_v54 = vmul.f32 0.03125, %v357_v47  ;;  %v531_v55 = vmul.f32 %v2352_v33, %v493_v3 }
 0x165   :  { %v1663_v58 = vpop.eup %1662  ;;  %1676 = vrsqrt.f32 %v438_v6  ;;  %v532_v30 = vmul.f32 %v2352_v33, %v494_v53 }
 0x166   :  { %v1665_v13 = vpop.eup %1664  ;;  %v439_v63 = vadd.f32 1e-06, %v407_v51  ;;  %v440_v56 = vadd.f32 1e-06, %v408_v54  ;;  %v569_v57 = vadd.f32 %v2359_v9, %v531_v55  ;;  %v495_v43 = vmul.f32 %v1663_v58, %v2175_v46 }
 0x167   :  { %v359_v8 = vpop.xlane.xlu1 %358  ;;  %v361_v10 = vpop.xlane.xlu0 %360  ;;  %v496_v11 = vmul.f32 %v1665_v13, %v2184_v59  ;;  %v570_v59 = vadd.f32 %v2359_v9, %v532_v30 }
 0x168   :  { %1678 = vrsqrt.f32 %v439_v63  ;;  %v409_v16 = vmul.f32 0.03125, %v359_v8  ;;  %v410_v45 = vmul.f32 0.03125, %v361_v10  ;;  %v600_v20 = vpack.c.bf16 %v569_v57, %v568_v41 }
 0x169   :  { %v1667_v60 = vpop.eup %1666  ;;  %1680 = vrsqrt.f32 %v440_v56  ;;  %v533_v61 = vmul.f32 %v2352_v33, %v495_v43  ;;  %v534_v28 = vmul.f32 %v2352_v33, %v496_v11 }
 0x16a   :  { %v1669_v19 = vpop.eup %1668  ;;  %v441_v0 = vadd.f32 1e-06, %v409_v16  ;;  %v442_v1 = vadd.f32 1e-06, %v410_v45  ;;  %1551 = vmatprep.mubr.bf16.mxu0 %v600_v20  ;;  %v497_v46 = vmul.f32 %v1667_v60, %v2187_v62 }
 0x16b   :  { %v363_v49 = vpop.xlane.xlu1 %362  ;;  %v365_v38 = vpop.xlane.xlu0 %364  ;;  %v571_v5 = vadd.f32 %v2359_v9, %v533_v61  ;;  %v498_v39 = vmul.f32 %v1669_v19, %v2196_v14  ;;  %v572_v53 = vadd.f32 %v2359_v9, %v534_v28 }
 0x16c   :  { %1682 = vrsqrt.f32 %v441_v0  ;;  %v411_v37 = vmul.f32 0.03125, %v363_v49  ;;  %v412_v6 = vmul.f32 0.03125, %v365_v38  ;;  %v535_v3 = vmul.f32 %v2352_v33, %v497_v46 }
 0x16d   :  { %v1671_v29 = vpop.eup %1670  ;;  %1684 = vrsqrt.f32 %v442_v1  ;;  %v601_v47 = vpack.c.bf16 %v571_v5, %v570_v59  ;;  %v536_v13 = vmul.f32 %v2352_v33, %v498_v39 }
 0x16e   :  { %v1673_v51 = vpop.eup %1672  ;;  %v443_v62 = vadd.f32 1e-06, %v411_v37  ;;  %v444_v54 = vadd.f32 1e-06, %v412_v6  ;;  %v573_v55 = vadd.f32 %v2359_v9, %v535_v3  ;;  %v499_v58 = vmul.f32 %v1671_v29, %v2199_v15 }
 0x16f   :  { %1552 = vmatmul.mubr.bf16.vlgmr.msra.gmra.mxu0 %v601_v47  ;;  %v367_v41 = vpop.xlane.xlu1 %366  ;;  %v369_v14 = vpop.xlane.xlu0 %368  ;;  %v500_v63 = vmul.f32 %v1673_v51, %v2208_v35  ;;  %v574_v35 = vadd.f32 %v2359_v9, %v536_v13 }
 0x170   :  { %1686 = vrsqrt.f32 %v443_v62  ;;  %v413_v56 = vmul.f32 0.03125, %v367_v41  ;;  %v414_v57 = vmul.f32 0.03125, %v369_v14  ;;  %v602_v43 = vpack.c.bf16 %v573_v55, %v572_v53 }
 0x171   :  { %v1675_v8 = vpop.eup %1674  ;;  %1688 = vrsqrt.f32 %v444_v54  ;;  %v537_v10 = vmul.f32 %v2352_v33, %v499_v58  ;;  %v538_v30 = vmul.f32 %v2352_v33, %v500_v63 }
 0x172   :  { %v1677_v11 = vpop.eup %1676  ;;  %v445_v16 = vadd.f32 1e-06, %v413_v56  ;;  %v446_v15 = vadd.f32 1e-06, %v414_v57  ;;  %1555 = vmatprep.mubr.bf16.mxu0 %v602_v43  ;;  %v501_v45 = vmul.f32 %v1675_v8, %v2211_v18 }
 0x173   :  { %v371_v20 = vpop.xlane.xlu1 %370  ;;  %v373_v60 = vpop.xlane.xlu0 %372  ;;  %v575_v61 = vadd.f32 %v2359_v9, %v537_v10  ;;  %v502_v28 = vmul.f32 %v1677_v11, %v2220_v50  ;;  %v576_v38 = vadd.f32 %v2359_v9, %v538_v30 }
 0x174   :  { %1690 = vrsqrt.f32 %v445_v16  ;;  %v415_v19 = vmul.f32 0.03125, %v371_v20  ;;  %v416_v0 = vmul.f32 0.03125, %v373_v60  ;;  %v539_v1 = vmul.f32 %v2352_v33, %v501_v45 }
 0x175   :  { %v1679_v46 = vpop.eup %1678  ;;  %1692 = vrsqrt.f32 %v446_v15  ;;  %v603_v49 = vpack.c.bf16 %v575_v61, %v574_v35  ;;  %v540_v3 = vmul.f32 %v2352_v33, %v502_v28 }
 0x176   :  { %v1681_v59 = vpop.eup %1680  ;;  %v447_v18 = vadd.f32 1e-06, %v415_v19  ;;  %v448_v5 = vadd.f32 1e-06, %v416_v0  ;;  %v577_v39 = vadd.f32 %v2359_v9, %v539_v1  ;;  %v503_v37 = vmul.f32 %v1679_v46, %v2223_v22 }
 0x177   :  { %1556 = vmatmul.mubr.bf16.gmra.mxu0 %v603_v49  ;;  %v375_v6 = vpop.xlane.xlu1 %374  ;;  %v377_v50 = vpop.xlane.xlu0 %376  ;;  %v504_v29 = vmul.f32 %v1681_v59, %v2232_v7  ;;  %v578_v7 = vadd.f32 %v2359_v9, %v540_v3 }
 0x178   :  { %1694 = vrsqrt.f32 %v447_v18  ;;  %v417_v47 = vmul.f32 0.03125, %v375_v6  ;;  %v418_v53 = vmul.f32 0.03125, %v377_v50  ;;  %v604_v51 = vpack.c.bf16 %v577_v39, %v576_v38 }
 0x179   :  { %v1683_v62 = vpop.eup %1682  ;;  %1696 = vrsqrt.f32 %v448_v5  ;;  %v541_v54 = vmul.f32 %v2352_v33, %v503_v37  ;;  %v542_v55 = vmul.f32 %v2352_v33, %v504_v29 }
 0x17a   :  { %v1685_v58 = vpop.eup %1684  ;;  %v449_v41 = vadd.f32 1e-06, %v417_v47  ;;  %v450_v22 = vadd.f32 1e-06, %v418_v53  ;;  %1559 = vmatprep.mubr.bf16.mxu0 %v604_v51  ;;  %v505_v14 = vmul.f32 %v1683_v62, %v2235_v26 }
 0x17b   :  { %v379_v13 = vpop.xlane.xlu1 %378  ;;  %v381_v63 = vpop.xlane.xlu0 %380  ;;  %v579_v56 = vadd.f32 %v2359_v9, %v541_v54  ;;  %v506_v57 = vmul.f32 %v1685_v58, %v2244_v25  ;;  %v580_v16 = vadd.f32 %v2359_v9, %v542_v55 }
 0x17c   :  { %1698 = vrsqrt.f32 %v449_v41  ;;  %v419_v43 = vmul.f32 0.03125, %v379_v13  ;;  %v420_v8 = vmul.f32 0.03125, %v381_v63  ;;  %v543_v10 = vmul.f32 %v2352_v33, %v505_v14 }
 0x17d   :  { %v1687_v30 = vpop.eup %1686  ;;  %1700 = vrsqrt.f32 %v450_v22  ;;  %v605_v11 = vpack.c.bf16 %v579_v56, %v578_v7  ;;  %v544_v61 = vmul.f32 %v2352_v33, %v506_v57 }
 0x17e   :  { %v1689_v15 = vpop.eup %1688  ;;  %v451_v26 = vadd.f32 1e-06, %v419_v43  ;;  %v452_v45 = vadd.f32 1e-06, %v420_v8  ;;  %v581_v20 = vadd.f32 %v2359_v9, %v543_v10  ;;  %v507_v60 = vmul.f32 %v1687_v30, %v2247_v32 }
 0x17f   :  { %1560 = vmatmul.mubr.bf16.gmra.mxu0 %v605_v11  ;;  %v383_v35 = vpop.xlane.xlu1 %382  ;;  %v385_v25 = vpop.xlane.xlu0 %384  ;;  %v508_v28 = vmul.f32 %v1689_v15, %v2256_v42  ;;  %v582_v42 = vadd.f32 %v2359_v9, %v544_v61 }
 0x180   :  { %1702 = vrsqrt.f32 %v451_v26  ;;  %v421_v19 = vmul.f32 0.03125, %v383_v35  ;;  %v422_v0 = vmul.f32 0.03125, %v385_v25  ;;  %v606_v1 = vpack.c.bf16 %v581_v20, %v580_v16 }
 0x181   :  { %v1691_v46 = vpop.eup %1690  ;;  %1704 = vrsqrt.f32 %v452_v45  ;;  %v545_v49 = vmul.f32 %v2352_v33, %v507_v60  ;;  %v546_v38 = vmul.f32 %v2352_v33, %v508_v28 }
 0x182   :  { %v1693_v59 = vpop.eup %1692  ;;  %v453_v18 = vadd.f32 1e-06, %v421_v19  ;;  %v454_v32 = vadd.f32 1e-06, %v422_v0  ;;  %1563 = vmatprep.mubr.bf16.mxu0 %v606_v1  ;;  %v509_v5 = vmul.f32 %v1691_v46, %v2259_v36 }
 0x183   :  { %v387_v39 = vpop.xlane.xlu1 %386  ;;  %v389_v37 = vpop.xlane.xlu0 %388  ;;  %v583_v6 = vadd.f32 %v2359_v9, %v545_v49  ;;  %v510_v50 = vmul.f32 %v1693_v59, %v2268_v12  ;;  %v584_v62 = vadd.f32 %v2359_v9, %v546_v38 }
 0x184   :  { %1706 = vrsqrt.f32 %v453_v18  ;;  %v423_v3 = vmul.f32 0.03125, %v387_v39  ;;  %v424_v29 = vmul.f32 0.03125, %v389_v37  ;;  %v547_v47 = vmul.f32 %v2352_v33, %v509_v5 }
 0x185   :  { %v1695_v53 = vpop.eup %1694  ;;  %1708 = vrsqrt.f32 %v454_v32  ;;  %v607_v51 = vpack.c.bf16 %v583_v6, %v582_v42  ;;  %v548_v14 = vmul.f32 %v2352_v33, %v510_v50 }
 0x186   :  { %v1697_v54 = vpop.eup %1696  ;;  %v455_v36 = vadd.f32 1e-06, %v423_v3  ;;  %v456_v55 = vadd.f32 1e-06, %v424_v29  ;;  %v585_v58 = vadd.f32 %v2359_v9, %v547_v47  ;;  %v511_v41 = vmul.f32 %v1695_v53, %v2271_v40 }
 0x187   :  { %1564 = vmatmul.mubr.bf16.gmra.mxu0 %v607_v51  ;;  %v391_v22 = vpop.xlane.xlu1 %390  ;;  %v393_v12 = vpop.xlane.xlu0 %392  ;;  %v512_v13 = vmul.f32 %v1697_v54, %v2280_v17  ;;  %v586_v15 = vadd.f32 %v2359_v9, %v548_v14 }
 0x188   :  { %1710 = vrsqrt.f32 %v455_v36  ;;  %v425_v63 = vmul.f32 0.03125, %v391_v22  ;;  %v426_v7 = vmul.f32 0.03125, %v393_v12  ;;  %v608_v56 = vpack.c.bf16 %v585_v58, %v584_v62 }
 0x189   :  { %v1699_v57 = vpop.eup %1698  ;;  %1712 = vrsqrt.f32 %v456_v55  ;;  %v549_v43 = vmul.f32 %v2352_v33, %v511_v41  ;;  %v550_v8 = vmul.f32 %v2352_v33, %v512_v13 }
 0x18a   :  { %v1701_v10 = vpop.eup %1700  ;;  %v457_v30 = vadd.f32 1e-06, %v425_v63  ;;  %v458_v40 = vadd.f32 1e-06, %v426_v7  ;;  %1567 = vmatprep.mubr.bf16.mxu0 %v608_v56  ;;  %v513_v11 = vmul.f32 %v1699_v57, %v2283_v44  ;;  %v1648_v57 = vld [vmem:[#allocation7 + $0x38] sm:$0xff]  }
 0x18b   :  { %v395_v16 = vpop.xlane.xlu1 %394  ;;  %v587_v17 = vadd.f32 %v2359_v9, %v549_v43  ;;  %v514_v26 = vmul.f32 %v1701_v10, %v2292_v4  ;;  %v588_v25 = vadd.f32 %v2359_v9, %v550_v8  ;;  %1583 = vmatprep.subr.bf16.mxu1 %v1648_v57  ;;  %v1649_v43 = vld [vmem:[#allocation7 + $0x30] sm:$0xff]   ;;  %v1651_v8 = vld [vmem:[#allocation7 + $0x20] sm:$0xff]  }
 0x18c   :  { %1714 = vrsqrt.f32 %v457_v30  ;;  %v427_v45 = vmul.f32 0.03125, %v395_v16  ;;  %v551_v20 = vmul.f32 %v2352_v33, %v513_v11  ;;  %1584 = vmatpush3.bf16.msra.mxu1 %v1648_v57  ;;  %v1653_v10 = vld [vmem:[#allocation7 + $0x10] sm:$0xff]   ;;  %v1655_v30 = vld [vmem:[#allocation7] sm:$0xff]  }
 0x18d   :  { %v1703_v60 = vpop.eup %1702  ;;  %1716 = vrsqrt.f32 %v458_v40  ;;  %v609_v35 = vpack.c.bf16 %v587_v17, %v586_v15  ;;  %v552_v0 = vmul.f32 %v2352_v33, %v514_v26  ;;  %1585 = vmatprep.subr.bf16.mxu1 %v1649_v43  ;;  %v2458_v40 = vld [vmem:[%s2667_s4] ss:$0 sm:$0xff] }
 0x18e   :  { %v1705_v61 = vpop.eup %1704  ;;  %v459_v28 = vadd.f32 1e-06, %v427_v45  ;;  %v589_v44 = vadd.f32 %v2359_v9, %v551_v20  ;;  %v515_v19 = vmul.f32 %v1703_v60, %v2295_v48 }
 0x18f   :  { %1568 = vmatmul.mubr.bf16.gmra.mxu0 %v609_v35  ;;  %v516_v4 = vmul.f32 %v1705_v61, %v2304_v23  ;;  %v590_v59 = vadd.f32 %v2359_v9, %v552_v0 }
 0x190   :  { %1718 = vrsqrt.f32 %v459_v28  ;;  %v610_v1 = vpack.c.bf16 %v589_v44, %v588_v25  ;;  %v553_v46 = vmul.f32 %v2352_v33, %v515_v19  ;;  %1586 = vmatpush3.bf16.msra.mxu1 %v1649_v43 }
 0x191   :  { %v1707_v49 = vpop.eup %1706  ;;  %v554_v48 = vmul.f32 %v2352_v33, %v516_v4 }
 0x192   :  { %v1709_v38 = vpop.eup %1708  ;;  %1571 = vmatprep.mubr.bf16.mxu0 %v610_v1  ;;  %v591_v18 = vadd.f32 %v2359_v9, %v553_v46  ;;  %v517_v32 = vmul.f32 %v1707_v49, %v2307_v52 }
 0x193   :  { %v518_v5 = vmul.f32 %v1709_v38, %v2316_v2  ;;  %v592_v6 = vadd.f32 %v2359_v9, %v554_v48 }
 0x194   :  { %v611_v39 = vpack.c.bf16 %v591_v18, %v590_v59  ;;  %v555_v23 = vmul.f32 %v2352_v33, %v517_v32 }
 0x195   :  { %v1711_v37 = vpop.eup %1710  ;;  %v556_v29 = vmul.f32 %v2352_v33, %v518_v5 }
 0x196   :  { %v1713_v42 = vpop.eup %1712  ;;  %v593_v50 = vadd.f32 %v2359_v9, %v555_v23  ;;  %v519_v3 = vmul.f32 %v1711_v37, %v2319_v27 }
 0x197   :  { %1572 = vmatmul.mubr.bf16.gmra.mxu0 %v611_v39  ;;  %v520_v52 = vmul.f32 %v1713_v42, %v2328_v21  ;;  %v594_v62 = vadd.f32 %v2359_v9, %v556_v29 }
 0x198   :  { %v612_v47 = vpack.c.bf16 %v593_v50, %v592_v6  ;;  %v557_v53 = vmul.f32 %v2352_v33, %v519_v3 }
 0x199   :  { %v1715_v2 = vpop.eup %1714  ;;  %v558_v55 = vmul.f32 %v2352_v33, %v520_v52 }
 0x19a   :  { %v1717_v51 = vpop.eup %1716  ;;  %1575 = vmatprep.mubr.bf16.mxu0 %v612_v47  ;;  %v595_v54 = vadd.f32 %v2359_v9, %v557_v53  ;;  %v521_v36 = vmul.f32 %v1715_v2, %v2331_v24 }
 0x19b   :  { %v522_v27 = vmul.f32 %v1717_v51, %v2340_v31  ;;  %v596_v22 = vadd.f32 %v2359_v9, %v558_v55 }
 0x19c   :  { %v613_v58 = vpack.c.bf16 %v595_v54, %v594_v62  ;;  %v559_v41 = vmul.f32 %v2352_v33, %v521_v36 }
 0x19d   :  { %v1719_v21 = vpop.eup %1718  ;;  %v560_v13 = vmul.f32 %v2352_v33, %v522_v27 }
 0x19e   :  { %v597_v12 = vadd.f32 %v2359_v9, %v559_v41  ;;  %v523_v14 = vmul.f32 %v1719_v21, %v2343_v34  ;;  %v1650_v34 = vld [vmem:[#allocation7 + $0x28] sm:$0xff]  }
 0x19f   :  { %1576 = vmatmul.mubr.bf16.gmra.mxu0 %v613_v58  ;;  %v598_v7 = vadd.f32 %v2359_v9, %v560_v13  ;;  %1587 = vmatprep.subr.bf16.mxu1 %v1650_v34 }
 0x1a0   :  { %v614_v63 = vpack.c.bf16 %v597_v12, %v596_v22  ;;  %v561_v24 = vmul.f32 %v2352_v33, %v523_v14  ;;  %1588 = vmatpush3.bf16.msra.mxu1 %v1650_v34  ;;  %v1652_v33 = vld [vmem:[#allocation7 + $0x18] sm:$0xff]  }
 0x1a1   :  { %1589 = vmatprep.subr.bf16.mxu1 %v1651_v8 }
 0x1a2   :  { %1579 = vmatprep.mubr.bf16.mxu0 %v614_v63  ;;  %v599_v31 = vadd.f32 %v2359_v9, %v561_v24  ;;  %v1654_v9 = vld [vmem:[#allocation7 + $0x8] sm:$0xff]  }
 0x1a4   :  { %v615_v56 = vpack.c.bf16 %v599_v31, %v598_v7  ;;  %1590 = vmatpush3.bf16.msra.mxu1 %v1651_v8 }
 0x1a5   :  { %1591 = vmatprep.subr.bf16.mxu1 %v1652_v33 }
 0x1a7   :  { %1580 = vmatmul.mubr.bf16.gmra.mxu0 %v615_v56 }
 0x1a8   :  { %1592 = vmatpush3.bf16.msra.mxu1 %v1652_v33 }
 0x1a9   :  { %1593 = vmatprep.subr.bf16.mxu1 %v1653_v10 }
 0x1ac   :  { %1594 = vmatpush3.bf16.msra.mxu1 %v1653_v10 }
 0x1ad   :  { %1595 = vmatprep.subr.bf16.mxu1 %v1654_v9 }
 0x1b0   :  { %1596 = vmatpush3.bf16.msra.mxu1 %v1654_v9 }
 0x1b1   :  { %1597 = vmatprep.subr.bf16.mxu1 %v1655_v30 }
 0x1b4   :  { %1598 = vmatpush3.bf16.msra.mxu1 %v1655_v30 }
 0x22f   :  { %v1553_v11 = vpop.f32.mrf.mxu0 }
 0x230   :  { %v2461_v16 = vadd.f32 %v1553_v11, %v2458_v40 }
 0x231   :  { %v760_v15 = vpop.f32.mrf.mxu0 }
 0x232   :  { %v1449_v17 = vmul.f32 -1.442695, %v2461_v16  ;;  %v2465_v26 = vadd.f32 %v2458_v40, %v760_v15 }
 0x233   :  { %v1554_v45 = vpop.f32.mrf.mxu0 }
 0x234   :  { %1720 = vpow2.f32 %v1449_v17  ;;  %v1447_v20 = vmul.f32 -1.442695, %v2465_v26  ;;  %v2469_v60 = vadd.f32 %v1554_v45, %v2458_v40 }
 0x235   :  { %v763_v35 = vpop.f32.mrf.mxu0 }
 0x236   :  { %1722 = vpow2.f32 %v1447_v20  ;;  %v1450_v25 = vmul.f32 -1.442695, %v2469_v60  ;;  %v2473_v61 = vadd.f32 %v2458_v40, %v763_v35 }
 0x237   :  { %v1557_v28 = vpop.f32.mrf.mxu0 }
 0x238   :  { %1724 = vpow2.f32 %v1450_v25  ;;  %v1448_v44 = vmul.f32 -1.442695, %v2473_v61  ;;  %v2477_v19 = vadd.f32 %v1557_v28, %v2458_v40 }
 0x239   :  { %v776_v0 = vpop.f32.mrf.mxu0 }
 0x23a   :  { %1726 = vpow2.f32 %v1448_v44  ;;  %v1453_v4 = vmul.f32 -1.442695, %v2477_v19  ;;  %v2481_v1 = vadd.f32 %v2458_v40, %v776_v0 }
 0x23b   :  { %v1558_v46 = vpop.f32.mrf.mxu0 }
 0x23c   :  { %1728 = vpow2.f32 %v1453_v4  ;;  %v1451_v49 = vmul.f32 -1.442695, %v2481_v1  ;;  %v2485_v38 = vadd.f32 %v1558_v46, %v2458_v40 }
 0x23d   :  { %v779_v59 = vpop.f32.mrf.mxu0 }
 0x23e   :  { %1730 = vpow2.f32 %v1451_v49  ;;  %v1454_v18 = vmul.f32 -1.442695, %v2485_v38  ;;  %v2489_v32 = vadd.f32 %v2458_v40, %v779_v59 }
 0x23f   :  { %v1561_v48 = vpop.f32.mrf.mxu0 }
 0x240   :  { %1732 = vpow2.f32 %v1454_v18  ;;  %v1452_v5 = vmul.f32 -1.442695, %v2489_v32  ;;  %v2493_v39 = vadd.f32 %v1561_v48, %v2458_v40 }
 0x241   :  { %v1721_v23 = vpop.eup %1720  ;;  %v792_v37 = vpop.f32.mrf.mxu0 }
 0x242   :  { %v985_v42 = vadd.f32 1.0, %v1721_v23  ;;  %1734 = vpow2.f32 %v1452_v5  ;;  %v1457_v6 = vmul.f32 -1.442695, %v2493_v39  ;;  %v2497_v50 = vadd.f32 %v2458_v40, %v792_v37 }
 0x243   :  { %v1723_v3 = vpop.eup %1722  ;;  %v1562_v29 = vpop.f32.mrf.mxu0 }
 0x244   :  { %1736 = vrcp.f32 %v985_v42  ;;  %v983_v52 = vadd.f32 1.0, %v1723_v3  ;;  %v1455_v47 = vmul.f32 -1.442695, %v2497_v50  ;;  %v2501_v53 = vadd.f32 %v1562_v29, %v2458_v40 }
 0x245   :  { %v1725_v2 = vpop.eup %1724  ;;  %1738 = vpow2.f32 %v1457_v6  ;;  %v795_v51 = vpop.f32.mrf.mxu0 }
 0x246   :  { %1740 = vrcp.f32 %v983_v52  ;;  %v986_v62 = vadd.f32 1.0, %v1725_v2  ;;  %v1458_v54 = vmul.f32 -1.442695, %v2501_v53  ;;  %v2505_v36 = vadd.f32 %v2458_v40, %v795_v51 }
 0x247   :  { %v1727_v55 = vpop.eup %1726  ;;  %1742 = vpow2.f32 %v1455_v47  ;;  %v1565_v27 = vpop.f32.mrf.mxu0 }
 0x248   :  { %1744 = vrcp.f32 %v986_v62  ;;  %v984_v58 = vadd.f32 1.0, %v1727_v55  ;;  %v1456_v41 = vmul.f32 -1.442695, %v2505_v36  ;;  %v2509_v21 = vadd.f32 %v1565_v27, %v2458_v40 }
 0x249   :  { %v1729_v22 = vpop.eup %1728  ;;  %1746 = vpow2.f32 %v1458_v54  ;;  %v808_v12 = vpop.f32.mrf.mxu0 }
 0x24a   :  { %1748 = vrcp.f32 %v984_v58  ;;  %v989_v14 = vadd.f32 1.0, %v1729_v22  ;;  %v1461_v13 = vmul.f32 -1.442695, %v2509_v21  ;;  %v2513_v63 = vadd.f32 %v2458_v40, %v808_v12 }
 0x24b   :  { %v1731_v24 = vpop.eup %1730  ;;  %1750 = vpow2.f32 %v1456_v41  ;;  %v1566_v7 = vpop.f32.mrf.mxu0 }
 0x24c   :  { %1752 = vrcp.f32 %v989_v14  ;;  %v987_v31 = vadd.f32 1.0, %v1731_v24  ;;  %v1459_v56 = vmul.f32 -1.442695, %v2513_v63  ;;  %v2517_v57 = vadd.f32 %v1566_v7, %v2458_v40 }
 0x24d   :  { %v1733_v43 = vpop.eup %1732  ;;  %1754 = vpow2.f32 %v1461_v13  ;;  %v811_v34 = vpop.f32.mrf.mxu0 }
 0x24e   :  { %1756 = vrcp.f32 %v987_v31  ;;  %v990_v8 = vadd.f32 1.0, %v1733_v43  ;;  %v1462_v33 = vmul.f32 -1.442695, %v2517_v57  ;;  %v2521_v10 = vadd.f32 %v2458_v40, %v811_v34 }
 0x24f   :  { %v1735_v9 = vpop.eup %1734  ;;  %1758 = vpow2.f32 %v1459_v56  ;;  %v1569_v30 = vpop.f32.mrf.mxu0 }
 0x250   :  { %1760 = vrcp.f32 %v990_v8  ;;  %v988_v11 = vadd.f32 1.0, %v1735_v9  ;;  %v1460_v15 = vmul.f32 -1.442695, %v2521_v10  ;;  %v2525_v17 = vadd.f32 %v1569_v30, %v2458_v40 }
 0x251   :  { %v1737_v45 = vpop.eup %1736  ;;  %1762 = vpow2.f32 %v1462_v33  ;;  %v824_v20 = vpop.f32.mrf.mxu0 }
 0x252   :  { %v1739_v35 = vpop.eup %1738  ;;  %1764 = vrcp.f32 %v988_v11  ;;  %v1465_v25 = vmul.f32 -1.442695, %v2525_v17  ;;  %v2529_v28 = vadd.f32 %v2458_v40, %v824_v20 }
 0x253   :  { %v1741_v44 = vpop.eup %1740  ;;  %v993_v0 = vadd.f32 1.0, %v1739_v35  ;;  %1766 = vpow2.f32 %v1460_v15  ;;  %v1570_v4 = vpop.f32.mrf.mxu0 }
 0x254   :  { %v1743_v46 = vpop.eup %1742  ;;  %1768 = vpow2.f32 %v1465_v25  ;;  %v1463_v49 = vmul.f32 -1.442695, %v2529_v28  ;;  %v2533_v59 = vadd.f32 %v1570_v4, %v2458_v40  ;;  %v1079_v58 = vmul.f32 %v1741_v44, %v2465_v26 }
 0x255   :  { %v1745_v18 = vpop.eup %1744  ;;  %1770 = vrcp.f32 %v993_v0  ;;  %v991_v48 = vadd.f32 1.0, %v1743_v46  ;;  %v827_v5 = vpop.f32.mrf.mxu0 }
 0x256   :  { %v1747_v23 = vpop.eup %1746  ;;  %1772 = vpow2.f32 %v1463_v49  ;;  %v1466_v37 = vmul.f32 -1.442695, %v2533_v59  ;;  %v2537_v42 = vadd.f32 %v2458_v40, %v827_v5  ;;  %v1082_v3 = vmul.f32 %v1745_v18, %v2469_v60 }
 0x257   :  { %v1749_v6 = vpop.eup %1748  ;;  %1774 = vrcp.f32 %v991_v48  ;;  %v994_v29 = vadd.f32 1.0, %v1747_v23  ;;  %v1573_v52 = vpop.f32.mrf.mxu0  ;;  %v1081_v60 = vmul.f32 %v1737_v45, %v2461_v16 }
 0x258   :  { %v1751_v47 = vpop.eup %1750  ;;  %1776 = vpow2.f32 %v1466_v37  ;;  %v1464_v2 = vmul.f32 -1.442695, %v2537_v42  ;;  %v2542_v51 = vadd.f32 %v1573_v52, %v2458_v40  ;;  %v1080_v62 = vmul.f32 %v1749_v6, %v2473_v61 }
 0x259   :  { %v1753_v54 = vpop.eup %1752  ;;  %1778 = vrcp.f32 %v994_v29  ;;  %v992_v55 = vadd.f32 1.0, %v1751_v47  ;;  %v840_v27 = vpop.f32.mrf.mxu0  ;;  %v1112_v56 = vpack.c.bf16 %v1082_v3, %v1081_v60 }
 0x25a   :  { %v1755_v41 = vpop.eup %1754  ;;  %1780 = vpow2.f32 %v1464_v2  ;;  %v1469_v22 = vmul.f32 -1.442695, %v2542_v51  ;;  %v2549_v12 = vadd.f32 %v2458_v40, %v840_v27  ;;  %v1111_v61 = vpack.c.bf16 %v1080_v62, %v1079_v58 }
 0x25b   :  { %v1757_v14 = vpop.eup %1756  ;;  %1782 = vrcp.f32 %v992_v55  ;;  %v997_v13 = vadd.f32 1.0, %v1755_v41  ;;  %v1574_v24 = vpop.f32.mrf.mxu0  ;;  %v1085_v4 = vmul.f32 %v1753_v54, %v2477_v19 }
 0x25c   :  { %v1759_v7 = vpop.eup %1758  ;;  %1784 = vpow2.f32 %v1469_v22  ;;  %v1467_v31 = vmul.f32 -1.442695, %v2549_v12  ;;  %v2553_v26 = vadd.f32 %v1574_v24, %v2458_v40  ;;  %1599 = vmatprep.mubr.bf16.mxu1 %v1111_v61  ;;  %v1083_v46 = vmul.f32 %v1757_v14, %v2481_v1 }
 0x25d   :  { %v1761_v16 = vpop.eup %1760  ;;  %1786 = vrcp.f32 %v997_v13  ;;  %v995_v43 = vadd.f32 1.0, %v1759_v7  ;;  %v843_v34 = vpop.f32.mrf.mxu0  ;;  %1600 = vmatmul.mubr.bf16.vlgmr.msra.gmra.mxu1 %v1112_v56 }
 0x25e   :  { %v1763_v8 = vpop.eup %1762  ;;  %1788 = vpow2.f32 %v1467_v31  ;;  %v1470_v33 = vmul.f32 -1.442695, %v2553_v26  ;;  %v2557_v9 = vadd.f32 %v2458_v40, %v843_v34  ;;  %v1086_v11 = vmul.f32 %v1761_v16, %v2485_v38 }
 0x25f   :  { %v1765_v30 = vpop.eup %1764  ;;  %1790 = vrcp.f32 %v995_v43  ;;  %v998_v15 = vadd.f32 1.0, %v1763_v8  ;;  %v1577_v45 = vpop.f32.mrf.mxu0 }
 0x260   :  { %v1767_v20 = vpop.eup %1766  ;;  %v1084_v35 = vmul.f32 %v1765_v30, %v2489_v32  ;;  %1792 = vpow2.f32 %v1470_v33  ;;  %v1468_v25 = vmul.f32 -1.442695, %v2557_v9  ;;  %v2563_v44 = vadd.f32 %v1577_v45, %v2458_v40 }
 0x261   :  { %v1769_v0 = vpop.eup %1768  ;;  %1794 = vrcp.f32 %v998_v15  ;;  %v996_v49 = vadd.f32 1.0, %v1767_v20  ;;  %v856_v38 = vpop.f32.mrf.mxu0  ;;  %v1114_v3 = vpack.c.bf16 %v1086_v11, %v1085_v4 }
 0x262   :  { %v1771_v18 = vpop.eup %1770  ;;  %v1001_v48 = vadd.f32 1.0, %v1769_v0  ;;  %1796 = vpow2.f32 %v1468_v25  ;;  %v1473_v5 = vmul.f32 -1.442695, %v2563_v44  ;;  %v2569_v32 = vadd.f32 %v2458_v40, %v856_v38 }
 0x263   :  { %v1773_v23 = vpop.eup %1772  ;;  %1798 = vrcp.f32 %v996_v49  ;;  %v1578_v37 = vpop.f32.mrf.mxu0  ;;  %v1113_v6 = vpack.c.bf16 %v1084_v35, %v1083_v46  ;;  %v1089_v7 = vmul.f32 %v1771_v18, %v2493_v39 }
 0x264   :  { %v1775_v29 = vpop.eup %1774  ;;  %1800 = vrcp.f32 %v1001_v48  ;;  %v999_v19 = vadd.f32 1.0, %v1773_v23  ;;  %v1471_v1 = vmul.f32 -1.442695, %v2569_v32  ;;  %v2573_v52 = vadd.f32 %v1578_v37, %v2458_v40 }
 0x265   :  { %v1777_v47 = vpop.eup %1776  ;;  %1802 = vpow2.f32 %v1473_v5  ;;  %1603 = vmatprep.mubr.bf16.mxu1 %v1113_v6  ;;  %v859_v2 = vpop.f32.mrf.mxu0  ;;  %v1087_v31 = vmul.f32 %v1775_v29, %v2497_v50 }
 0x266   :  { %v1779_v62 = vpop.eup %1778  ;;  %1804 = vrcp.f32 %v999_v19  ;;  %v1002_v54 = vadd.f32 1.0, %v1777_v47  ;;  %v1474_v55 = vmul.f32 -1.442695, %v2573_v52  ;;  %v2577_v27 = vadd.f32 %v2458_v40, %v859_v2  ;;  %1604 = vmatmul.mubr.bf16.gmra.mxu1 %v1114_v3 }
 0x267   :  { %v1781_v58 = vpop.eup %1780  ;;  %v1090_v41 = vmul.f32 %v1779_v62, %v2501_v53  ;;  %1806 = vpow2.f32 %v1471_v1  ;;  %v1581_v60 = vpop.f32.mrf.mxu0 }
 0x268   :  { %v1783_v22 = vpop.eup %1782  ;;  %1808 = vrcp.f32 %v1002_v54  ;;  %v1000_v14 = vadd.f32 1.0, %v1781_v58  ;;  %v1472_v13 = vmul.f32 -1.442695, %v2577_v27  ;;  %v2582_v24 = vadd.f32 %v1581_v60, %v2458_v40 }
 0x269   :  { %v1785_v61 = vpop.eup %1784  ;;  %v1088_v56 = vmul.f32 %v1783_v22, %v2505_v36  ;;  %1810 = vpow2.f32 %v1474_v55  ;;  %v872_v16 = vpop.f32.mrf.mxu0  ;;  %v1116_v15 = vpack.c.bf16 %v1090_v41, %v1089_v7 }
 0x26a   :  { %v1787_v53 = vpop.eup %1786  ;;  %1812 = vrcp.f32 %v1000_v14  ;;  %v1005_v43 = vadd.f32 1.0, %v1785_v61  ;;  %v1477_v34 = vmul.f32 -1.442695, %v2582_v24  ;;  %v2589_v8 = vadd.f32 %v2458_v40, %v872_v16 }
 0x26b   :  { %v1789_v33 = vpop.eup %1788  ;;  %1814 = vpow2.f32 %v1472_v13  ;;  %v1582_v30 = vpop.f32.mrf.mxu0  ;;  %v1115_v11 = vpack.c.bf16 %v1088_v56, %v1087_v31 }
 0x26c   :  { %v1791_v39 = vpop.eup %1790  ;;  %1816 = vrcp.f32 %v1005_v43  ;;  %v1003_v50 = vadd.f32 1.0, %v1789_v33  ;;  %v1475_v36 = vmul.f32 -1.442695, %v2589_v8  ;;  %v2593_v45 = vadd.f32 %v1582_v30, %v2458_v40 }
 0x26d   :  { %v1793_v20 = vpop.eup %1792  ;;  %1818 = vpow2.f32 %v1477_v34  ;;  %1607 = vmatprep.mubr.bf16.mxu1 %v1115_v11  ;;  %v875_v35 = vpop.f32.mrf.mxu0  ;;  %v1091_v37 = vmul.f32 %v1791_v39, %v2513_v63 }
 0x26e   :  { %v1795_v25 = vpop.eup %1794  ;;  %1820 = vrcp.f32 %v1003_v50  ;;  %v1006_v0 = vadd.f32 1.0, %v1793_v20  ;;  %v1478_v4 = vmul.f32 -1.442695, %v2593_v45  ;;  %v2597_v46 = vadd.f32 %v2458_v40, %v875_v35  ;;  %1608 = vmatmul.mubr.bf16.gmra.mxu1 %v1116_v15 }
 0x26f   :  { %v1797_v49 = vpop.eup %1796  ;;  %1822 = vpow2.f32 %v1475_v36  ;;  %v1094_v18 = vmul.f32 %v1795_v25, %v2517_v57  ;;  %v1093_v40 = vmul.f32 %v1787_v53, %v2509_v21 }
 0x270   :  { %v1799_v38 = vpop.eup %1798  ;;  %1824 = vrcp.f32 %v1006_v0  ;;  %v1004_v48 = vadd.f32 1.0, %v1797_v49  ;;  %v1476_v5 = vmul.f32 -1.442695, %v2597_v46 }
 0x271   :  { %v1801_v23 = vpop.eup %1800  ;;  %v1092_v6 = vmul.f32 %v1799_v38, %v2521_v10  ;;  %1826 = vpow2.f32 %v1478_v4  ;;  %v1118_v47 = vpack.c.bf16 %v1094_v18, %v1093_v40  ;;  %v1849_v40 = vld [vmem:[#allocation2] sm:$0xff] }
 0x272   :  { %v1803_v3 = vpop.eup %1802  ;;  %1828 = vrcp.f32 %v1004_v48  ;;  %v1097_v13 = vmul.f32 %v1801_v23, %v2525_v17 }
 0x273   :  { %v1805_v29 = vpop.eup %1804  ;;  %1830 = vpow2.f32 %v1476_v5  ;;  %v1117_v19 = vpack.c.bf16 %v1092_v6, %v1091_v37  ;;  %v1009_v54 = vadd.f32 1.0, %v1803_v3  ;;  %v1848_v6 = vld [vmem:[#allocation2 + $0x10] sm:$0xff] }
 0x274   :  { %v1807_v1 = vpop.eup %1806  ;;  %v1095_v10 = vmul.f32 %v1805_v29, %v2529_v28 }
 0x275   :  { %v1809_v57 = vpop.eup %1808  ;;  %v1007_v2 = vadd.f32 1.0, %v1807_v1  ;;  %1611 = vmatprep.mubr.bf16.mxu1 %v1117_v19 }
 0x276   :  { %v1811_v62 = vpop.eup %1810  ;;  %1612 = vmatmul.mubr.bf16.gmra.mxu1 %v1118_v47  ;;  %v1098_v41 = vmul.f32 %v1809_v57, %v2533_v59  ;;  %v1851_v47 = vld [vmem:[#allocation2 + $0x8] sm:$0xff] }
 0x277   :  { %v1813_v55 = vpop.eup %1812  ;;  %v1010_v63 = vadd.f32 1.0, %v1811_v62  ;;  %1832 = vrcp.f32 %v1007_v2 }
 0x278   :  { %v1815_v58 = vpop.eup %1814  ;;  %v1096_v21 = vmul.f32 %v1813_v55, %v2537_v42  ;;  %v1120_v56 = vpack.c.bf16 %v1098_v41, %v1097_v13 }
 0x279   :  { %v1817_v60 = vpop.eup %1816  ;;  %1834 = vrcp.f32 %v1010_v63  ;;  %v1008_v22 = vadd.f32 1.0, %v1815_v58 }
 0x27a   :  { %v1819_v14 = vpop.eup %1818  ;;  %1836 = vrcp.f32 %v1009_v54  ;;  %v1119_v61 = vpack.c.bf16 %v1096_v21, %v1095_v10  ;;  %v1101_v15 = vmul.f32 %v1817_v60, %v2542_v51  ;;  %v1852_v54 = vld [vmem:[#allocation2 + $0x30] sm:$0xff]  ;;  %v1853_v10 = vld [vmem:[#allocation2 + $0x20] sm:$0xff] }
 0x27b   :  { %v1821_v7 = vpop.eup %1820  ;;  %1838 = vrcp.f32 %v1008_v22  ;;  %v1013_v59 = vadd.f32 1.0, %v1819_v14  ;;  %v1854_v22 = vld [vmem:[#allocation2 + $0x38] sm:$0xff] }
 0x27c   :  { %v1823_v31 = vpop.eup %1822  ;;  %1615 = vmatprep.mubr.bf16.mxu1 %v1119_v61  ;;  %v1099_v33 = vmul.f32 %v1821_v7, %v2549_v12  ;;  %v1855_v7 = vld [vmem:[#allocation2 + $0x28] sm:$0xff] }
 0x27d   :  { %v1825_v16 = vpop.eup %1824  ;;  %v1011_v28 = vadd.f32 1.0, %v1823_v31 }
 0x27e   :  { %v1827_v53 = vpop.eup %1826  ;;  %1616 = vmatmul.mubr.bf16.gmra.mxu1 %v1120_v56  ;;  %v1102_v30 = vmul.f32 %v1825_v16, %v2553_v26 }
 0x27f   :  { %v1829_v42 = vpop.eup %1828  ;;  %v1014_v43 = vadd.f32 1.0, %v1827_v53  ;;  %1840 = vrcp.f32 %v1011_v28  ;;  %v1856_v28 = vld [vmem:[#allocation2 + $0x50] sm:$0xff] }
 0x280   :  { %v1831_v34 = vpop.eup %1830  ;;  %v1100_v17 = vmul.f32 %v1829_v42, %v2557_v9  ;;  %v1122_v50 = vpack.c.bf16 %v1102_v30, %v1101_v15 }
 0x281   :  { %1842 = vrcp.f32 %v1014_v43  ;;  %v1012_v11 = vadd.f32 1.0, %v1831_v34  ;;  %v1857_v43 = vld [vmem:[#allocation2 + $0x40] sm:$0xff] }
 0x282   :  { %1844 = vrcp.f32 %v1013_v59  ;;  %v1121_v39 = vpack.c.bf16 %v1100_v17, %v1099_v33  ;;  %v1858_v17 = vld [vmem:[#allocation2 + $0x58] sm:$0xff] }
 0x283   :  { %1846 = vrcp.f32 %v1012_v11 }
 0x284   :  { %1619 = vmatprep.mubr.bf16.mxu1 %v1121_v39  ;;  %v1833_v36 = vpop.eup %1832 }
 0x285   :  { %v1103_v26 = vmul.f32 %v1833_v36, %v2569_v32 }
 0x286   :  { %v1835_v20 = vpop.eup %1834  ;;  %1620 = vmatmul.mubr.bf16.gmra.mxu1 %v1122_v50  ;;  %v1859_v50 = vld [vmem:[#allocation2 + $0x48] sm:$0xff] }
 0x287   :  { %v1837_v35 = vpop.eup %1836  ;;  %v1106_v12 = vmul.f32 %v1835_v20, %v2573_v52 }
 0x288   :  { %v1839_v25 = vpop.eup %1838  ;;  %v1105_v0 = vmul.f32 %v1837_v35, %v2563_v44  ;;  %v2623_v44 = vld [vmem:[%s2669_s6] ss:$0 sm:$0xff]  ;;  %s1974_s6 = smov [#allocation8]  }
 0x289   :  { %v1104_v9 = vmul.f32 %v1839_v25, %v2577_v27  ;;  %v625_v3 = vadd.f32 %v1848_v6, %v2623_v44  ;;  %v624_v57 = vadd.f32 %v1851_v47, %v2623_v44  ;;  %v629_v55 = vadd.f32 %v1852_v54, %v2623_v44  ;;  %v1860_v25 = vld [vmem:[#allocation2 + $0x70] sm:$0xff]  ;;  %s1421_s22 = sshll.u32 %s1974_s6, 4  ;;  %s1422_s22 = int_to_ptr.vmem [resolvable:$true] %s1421_s22 }
 0x28a   :  { %v1124_v51 = vpack.c.bf16 %v1106_v12, %v1105_v0  ;;  %v627_v41 = vadd.f32 %v1853_v10, %v2623_v44  ;;  %v630_v14 = vadd.f32 %v1854_v22, %v2623_v44  ;;  %v628_v31 = vadd.f32 %v1855_v7, %v2623_v44  ;;  %v1861_v0 = vld [vmem:[#allocation2 + $0x60] sm:$0xff]  ;;  %s1940_s23 = scalar_lea.vmem %s1422_s22, 4096  ;;  %p1945_p2 = scmp.lt.s32.totalorder %s1422_s22, %s1422_s22 }
 0x28b   :  { %v1123_v4 = vpack.c.bf16 %v1104_v9, %v1103_v26  ;;  %v633_v53 = vadd.f32 %v1856_v28, %v2623_v44  ;;  %v631_v34 = vadd.f32 %v1857_v43, %v2623_v44  ;;  %v634_v11 = vadd.f32 %v1858_v17, %v2623_v44  ;;  %p1941_p1 = scmp.ne.s32.totalorder %s1422_s22, %s1940_s23  ;;  %p1946_p3 = scmp.lt.s32.totalorder %s1940_s23, %s1940_s23 }
 0x28c   :  { %v1841_v49 = vpop.eup %1840  ;;  %v632_v36 = vadd.f32 %v1859_v50, %v2623_v44  ;;  %v637_v12 = vadd.f32 %v1860_v25, %v2623_v44 }
 0x28d   :  { %1623 = vmatprep.mubr.bf16.mxu1 %v1123_v4  ;;  %v1107_v23 = vmul.f32 %v1841_v49, %v2589_v8  ;;  %v635_v4 = vadd.f32 %v1861_v0, %v2623_v44  ;;  %p1947_p4 = por %p1946_p3, %p1945_p2 }
 0x28e   :  { %v1843_v38 = vpop.eup %1842  ;;  %1624 = vmatmul.mubr.bf16.gmra.mxu1 %v1124_v51 }
 0x28f   :  { %v1845_v18 = vpop.eup %1844  ;;  %v1110_v5 = vmul.f32 %v1843_v38, %v2593_v45  ;;  %v623_v45 = vadd.f32 %v1849_v40, %v2623_v44  ;;  %v1862_v38 = vld [vmem:[#allocation2 + $0x78] sm:$0xff]  ;;  %p1948_p5 = pnand %p1947_p4, %p1941_p1 }
 0x290   :  { %v1847_v48 = vpop.eup %1846  ;;  %v1109_v32 = vmul.f32 %v1845_v18, %v2582_v24  ;;  %v638_v18 = vadd.f32 %v1862_v38, %v2623_v44 }
 0x291   :  { %v1108_v52 = vmul.f32 %v1847_v48, %v2597_v46  ;;  %v1850_v46 = vld [vmem:[#allocation2 + $0x18] sm:$0xff] }
 0x292   :  { %v1126_v27 = vpack.c.bf16 %v1110_v5, %v1109_v32  ;;  %v626_v24 = vadd.f32 %v1850_v46, %v2623_v44 }
 0x293   :  { %v1125_v37 = vpack.c.bf16 %v1108_v52, %v1107_v23  ;;  %v1863_v23 = vld [vmem:[#allocation2 + $0x68] sm:$0xff] }
 0x294   :  { %v636_v52 = vadd.f32 %v1863_v23, %v2623_v44 }
 0x295   :  { %1627 = vmatprep.mubr.bf16.mxu1 %v1125_v37 }
 0x296   :  { %1628 = vmatmul.mubr.bf16.gmra.mxu1 %v1126_v27  ;;  %v1864_v27 = vld [vmem:[#allocation2 + $0x90] sm:$0xff] }
 0x297   :  { %v641_v6 = vadd.f32 %v1864_v27, %v2623_v44 }
 0x31d   :  { %v1601_v8 = vpop.f32.mrf.mxu1 }
 0x31e   :  { %v1354_v29 = vadd.f32 %v1601_v8, %v625_v3 }
 0x31f   :  { %v1225_v19 = vpop.f32.mrf.mxu1 }
 0x320   :  { %1386 = vst [vmem:[#allocation8 + $0x10] sm:$0xff] %v1354_v29  ;;  %v1352_v1 = vadd.f32 %v1225_v19, %v623_v45  ;;  %v1865_v45 = vld [vmem:[#allocation2 + $0x80] sm:$0xff] }
 0x321   :  { %v1602_v2 = vpop.f32.mrf.mxu1  ;;  %v639_v8 = vadd.f32 %v1865_v45, %v2623_v44 }
 0x322   :  { %1384 = vst [vmem:[#allocation8] sm:$0xff] %v1352_v1  ;;  %v1355_v62 = vadd.f32 %v1602_v2, %v626_v24  ;;  %v1866_v24 = vld [vmem:[#allocation2 + $0x98] sm:$0xff] }
 0x323   :  { %v1228_v63 = vpop.f32.mrf.mxu1  ;;  %v642_v19 = vadd.f32 %v1866_v24, %v2623_v44 }
 0x324   :  { %1387 = vst [vmem:[#allocation8 + $0x18] sm:$0xff] %v1355_v62  ;;  %v1353_v58 = vadd.f32 %v1228_v63, %v624_v57  ;;  %v1867_v57 = vld [vmem:[#allocation2 + $0x88] sm:$0xff] }
 0x325   :  { %v640_v2 = vadd.f32 %v1867_v57, %v2623_v44 }
 0x326   :  { %v1605_v21 = vpop.f32.mrf.mxu1  ;;  %1385 = vst [vmem:[#allocation8 + $0x8] sm:$0xff] %v1353_v58 }
 0x327   :  { %v1358_v60 = vadd.f32 %v1605_v21, %v629_v55  ;;  %v1868_v55 = vld [vmem:[#allocation2 + $0xb0] sm:$0xff] }
 0x328   :  { %v1241_v13 = vpop.f32.mrf.mxu1  ;;  %v645_v63 = vadd.f32 %v1868_v55, %v2623_v44 }
 0x329   :  { %1390 = vst [vmem:[#allocation8 + $0x30] sm:$0xff] %v1358_v60  ;;  %v1356_v61 = vadd.f32 %v1241_v13, %v627_v41  ;;  %v1869_v41 = vld [vmem:[#allocation2 + $0xa0] sm:$0xff] }
 0x32a   :  { %v1606_v56 = vpop.f32.mrf.mxu1  ;;  %v643_v21 = vadd.f32 %v1869_v41, %v2623_v44 }
 0x32b   :  { %1388 = vst [vmem:[#allocation8 + $0x20] sm:$0xff] %v1356_v61  ;;  %v1359_v16 = vadd.f32 %v1606_v56, %v630_v14  ;;  %v1870_v14 = vld [vmem:[#allocation2 + $0xb8] sm:$0xff] }
 0x32c   :  { %v1244_v59 = vpop.f32.mrf.mxu1  ;;  %v646_v13 = vadd.f32 %v1870_v14, %v2623_v44 }
 0x32d   :  { %1391 = vst [vmem:[#allocation8 + $0x38] sm:$0xff] %v1359_v16  ;;  %v1357_v42 = vadd.f32 %v1244_v59, %v628_v31  ;;  %v1871_v31 = vld [vmem:[#allocation2 + $0xa8] sm:$0xff] }
 0x32e   :  { %v1609_v33 = vpop.f32.mrf.mxu1  ;;  %v644_v56 = vadd.f32 %v1871_v31, %v2623_v44 }
 0x32f   :  { %1389 = vst [vmem:[#allocation8 + $0x28] sm:$0xff] %v1357_v42  ;;  %v1362_v30 = vadd.f32 %v1609_v33, %v633_v53  ;;  %v1872_v53 = vld [vmem:[#allocation2 + $0xd0] sm:$0xff] }
 0x330   :  { %v1257_v15 = vpop.f32.mrf.mxu1  ;;  %v649_v59 = vadd.f32 %v1872_v53, %v2623_v44 }
 0x331   :  { %1394 = vst [vmem:[#allocation8 + $0x50] sm:$0xff] %v1362_v30  ;;  %v1360_v39 = vadd.f32 %v1257_v15, %v631_v34  ;;  %v1873_v34 = vld [vmem:[#allocation2 + $0xc0] sm:$0xff] }
 0x332   :  { %v1610_v20 = vpop.f32.mrf.mxu1  ;;  %v647_v33 = vadd.f32 %v1873_v34, %v2623_v44 }
 0x333   :  { %1392 = vst [vmem:[#allocation8 + $0x40] sm:$0xff] %v1360_v39  ;;  %v1363_v35 = vadd.f32 %v1610_v20, %v634_v11  ;;  %v1874_v11 = vld [vmem:[#allocation2 + $0xd8] sm:$0xff] }
 0x334   :  { %v1260_v26 = vpop.f32.mrf.mxu1  ;;  %v650_v15 = vadd.f32 %v1874_v11, %v2623_v44 }
 0x335   :  { %1395 = vst [vmem:[#allocation8 + $0x58] sm:$0xff] %v1363_v35  ;;  %v1361_v9 = vadd.f32 %v1260_v26, %v632_v36  ;;  %v1875_v36 = vld [vmem:[#allocation2 + $0xc8] sm:$0xff] }
 0x336   :  { %v1613_v51 = vpop.f32.mrf.mxu1  ;;  %v648_v20 = vadd.f32 %v1875_v36, %v2623_v44 }
 0x337   :  { %1393 = vst [vmem:[#allocation8 + $0x48] sm:$0xff] %v1361_v9  ;;  %v1366_v49 = vadd.f32 %v1613_v51, %v637_v12  ;;  %v1876_v12 = vld [vmem:[#allocation2 + $0xf0] sm:$0xff] }
 0x338   :  { %v1273_v48 = vpop.f32.mrf.mxu1  ;;  %v653_v26 = vadd.f32 %v1876_v12, %v2623_v44 }
 0x339   :  { %1398 = vst [vmem:[#allocation8 + $0x70] sm:$0xff] %v1366_v49  ;;  %v1364_v5 = vadd.f32 %v1273_v48, %v635_v4  ;;  %v1877_v4 = vld [vmem:[#allocation2 + $0xe0] sm:$0xff] }
 0x33a   :  { %v1614_v32 = vpop.f32.mrf.mxu1  ;;  %v651_v51 = vadd.f32 %v1877_v4, %v2623_v44 }
 0x33b   :  { %1396 = vst [vmem:[#allocation8 + $0x60] sm:$0xff] %v1364_v5  ;;  %v1367_v37 = vadd.f32 %v1614_v32, %v638_v18  ;;  %v1878_v18 = vld [vmem:[#allocation2 + $0xf8] sm:$0xff] }
 0x33c   :  { %v1276_v3 = vpop.f32.mrf.mxu1  ;;  %v654_v48 = vadd.f32 %v1878_v18, %v2623_v44 }
 0x33d   :  { %1399 = vst [vmem:[#allocation8 + $0x78] sm:$0xff] %v1367_v37  ;;  %v1365_v40 = vadd.f32 %v1276_v3, %v636_v52  ;;  %v1879_v52 = vld [vmem:[#allocation2 + $0xe8] sm:$0xff] }
 0x33e   :  { %v1617_v29 = vpop.f32.mrf.mxu1  ;;  %v652_v32 = vadd.f32 %v1879_v52, %v2623_v44 }
 0x33f   :  { %1397 = vst [vmem:[#allocation8 + $0x68] sm:$0xff] %v1365_v40  ;;  %v1370_v46 = vadd.f32 %v1617_v29, %v641_v6 }
 0x340   :  { %v1289_v1 = vpop.f32.mrf.mxu1 }
 0x341   :  { %1402 = vst [vmem:[#allocation8 + $0x90] sm:$0xff] %v1370_v46  ;;  %v1368_v47 = vadd.f32 %v1289_v1, %v639_v8 }
 0x342   :  { %v1618_v62 = vpop.f32.mrf.mxu1 }
 0x343   :  { %1400 = vst [vmem:[#allocation8 + $0x80] sm:$0xff] %v1368_v47  ;;  %v1371_v54 = vadd.f32 %v1618_v62, %v642_v19 }
 0x344   :  { %v1292_v58 = vpop.f32.mrf.mxu1 }
 0x345   :  { %1403 = vst [vmem:[#allocation8 + $0x98] sm:$0xff] %v1371_v54  ;;  %v1369_v10 = vadd.f32 %v1292_v58, %v640_v2 }
 0x346   :  { %v1621_v60 = vpop.f32.mrf.mxu1 }
 0x347   :  { %1401 = vst [vmem:[#allocation8 + $0x88] sm:$0xff] %v1369_v10  ;;  %v1374_v22 = vadd.f32 %v1621_v60, %v645_v63 }
 0x348   :  { %v1305_v61 = vpop.f32.mrf.mxu1 }
 0x349   :  { %1406 = vst [vmem:[#allocation8 + $0xb0] sm:$0xff] %v1374_v22  ;;  %v1372_v7 = vadd.f32 %v1305_v61, %v643_v21 }
 0x34a   :  { %v1622_v16 = vpop.f32.mrf.mxu1 }
 0x34b   :  { %1404 = vst [vmem:[#allocation8 + $0xa0] sm:$0xff] %v1372_v7  ;;  %v1375_v28 = vadd.f32 %v1622_v16, %v646_v13 }
 0x34c   :  { %v1308_v42 = vpop.f32.mrf.mxu1 }
 0x34d   :  { %1407 = vst [vmem:[#allocation8 + $0xb8] sm:$0xff] %v1375_v28  ;;  %v1373_v43 = vadd.f32 %v1308_v42, %v644_v56 }
 0x34e   :  { %v1625_v30 = vpop.f32.mrf.mxu1 }
 0x34f   :  { %1405 = vst [vmem:[#allocation8 + $0xa8] sm:$0xff] %v1373_v43  ;;  %v1378_v17 = vadd.f32 %v1625_v30, %v649_v59 }
 0x350   :  { %v1321_v39 = vpop.f32.mrf.mxu1 }
 0x351   :  { %1410 = vst [vmem:[#allocation8 + $0xd0] sm:$0xff] %v1378_v17  ;;  %v1376_v50 = vadd.f32 %v1321_v39, %v647_v33 }
 0x352   :  { %v1626_v35 = vpop.f32.mrf.mxu1 }
 0x353   :  { %1408 = vst [vmem:[#allocation8 + $0xc0] sm:$0xff] %v1376_v50  ;;  %v1379_v25 = vadd.f32 %v1626_v35, %v650_v15 }
 0x354   :  { %v1324_v9 = vpop.f32.mrf.mxu1 }
 0x355   :  { %1411 = vst [vmem:[#allocation8 + $0xd8] sm:$0xff] %v1379_v25  ;;  %v1377_v0 = vadd.f32 %v1324_v9, %v648_v20 }
 0x356   :  { %v1629_v49 = vpop.f32.mrf.mxu1 }
 0x357   :  { %1409 = vst [vmem:[#allocation8 + $0xc8] sm:$0xff] %v1377_v0  ;;  %v1382_v38 = vadd.f32 %v1629_v49, %v653_v26 }
 0x358   :  { %v1337_v5 = vpop.f32.mrf.mxu1 }
 0x359   :  { %1414 = vst [vmem:[#allocation8 + $0xf0] sm:$0xff] %v1382_v38  ;;  %v1380_v23 = vadd.f32 %v1337_v5, %v651_v51 }
 0x35a   :  { %v1630_v37 = vpop.f32.mrf.mxu1 }
 0x35b   :  { %1412 = vst [vmem:[#allocation8 + $0xe0] sm:$0xff] %v1380_v23  ;;  %v1383_v27 = vadd.f32 %v1630_v37, %v654_v48 }
 0x35c   :  { %v1340_v6 = vpop.f32.mrf.mxu1 }
 0x35d   :  { %1415 = vst [vmem:[#allocation8 + $0xf8] sm:$0xff] %v1383_v27  ;;  %v1381_v3 = vadd.f32 %v1340_v6, %v652_v32 }
 0x35f   :  { %1413 = vst [vmem:[#allocation8 + $0xe8] sm:$0xff] %v1381_v3 }
 0x360   :  { %1951 = shalt.err (!%p1948_p5)
}
 0x361   :  { %1427 = dma.vmem_to_hbm [thread:$0]  %s1422_s22, 4096, %s2670_s7, [#allocation4], %s1970_s11, %s1970_s11, %s1971_s12  }
 0x362   :  { %1964 = dma.done.wait [#allocation4], 4096  }
 0x363   :  { %1965 = vsyncadd [#allocation4], 4294963200 }
 0x364   :  { %1431 = vsyncpa [#allocation3], 1 }
 0x365   :  { %1432 = vsyncpa [#allocation6], 1 }
 0x366   :  { %1433 = vsyncpa [#allocation4], 1 }

</bundles_post_ra>
